<compile_context>
chip_gen: v7x
topology: tpu7x:2x2x1
jax: 0.10.0
libtpu: 0.0.40
codegen_flags: <defaults>
</compile_context>

<pallas_src>
import functools

import jax
import jax.numpy as jnp
from jax import lax
from jax.experimental import pallas as pl
from jax.experimental.pallas import tpu as pltpu

LANE = 128


def _round_up(x, m):
    return (x + m - 1) // m * m


def _vmem_limit_bytes():
    """Per-generation scoped-VMEM budget: ~half of physical VMEM, 32 MiB floor,
    96 MiB ceiling (v5e/v6e: 128 MiB physical -> 64 MiB; v7x: 64 MiB -> 32 MiB)."""
    try:
        cap = int(pltpu.get_tpu_info().vmem_capacity_bytes)
    except Exception:
        cap = 64 << 20          # conservative fallback if the info query is unavailable
    return max(32 << 20, min(cap // 2, 96 << 20))


def _plan_tap_groups(stride):
    """Group the 9 taps of the phase-decomposed stride-`stride` 3x3 conv by
    (phase, column-offset): each group needs a single (possibly sublane-misaligned)
    W-shifted window load; the per-tap row offsets inside a group become cheap,
    sublane-aligned value slices.

    Returns:
      groups:      [(phase, dc, dr_min, dr_span, rel_drs)]
      order:       permutation of original tap index kh*3+kw matching the concat order
      center_pos:  position of the (1,1) center tap in `order` (input of the 1x1 shortcut)
    """
    by_key = {}
    for kh in range(3):
        for kw in range(3):
            ph = (kh % stride) * stride + (kw % stride)
            dr, dc = kh // stride, kw // stride
            by_key.setdefault((ph, dc), []).append((dr, kh * 3 + kw))
    groups, order = [], []
    for (ph, dc), items in sorted(by_key.items()):
        items.sort()
        dr_min, dr_max = items[0][0], items[-1][0]
        groups.append((ph, dc, dr_min, dr_max - dr_min,
                       tuple(dr - dr_min for dr, _ in items)))
        order.extend(k for _, k in items)
    return groups, order, order.index(4)


# ----------------------------------------------------------------------------
# Pallas kernel: fused 3x3 conv (BN folded) (+ residual add) (+ fused 1x1 shortcut) (+ ReLU)
# ----------------------------------------------------------------------------
def _make_conv_kernel(groups, center_pos, *, relu, has_residual, emit_shortcut):
    def kernel(*refs):
        x_ref, w_ref, b_ref = refs[0], refs[1], refs[2]
        i = 3
        r_ref = wsc_ref = None
        if has_residual:
            r_ref = refs[i]; i += 1
        if emit_shortcut:
            wsc_ref = refs[i]; i += 1
        o_ref = refs[i]
        osc_ref = refs[i + 1] if emit_shortcut else None

        t = pl.program_id(1)                        # output-row-tile index
        _, tro, wo, cpo = o_ref.shape
        cpi = x_ref.shape[-1]
        m = tro * wo

        # In-kernel im2col: one W-shifted window load per (phase, dc) group,
        # cheap row sub-slices per tap, then a single wide-K MXU matmul.
        pieces = []
        for (ph, dc, dr_min, span, rel_drs) in groups:
            win = x_ref[ph, pl.ds(t * tro + dr_min, tro + span), pl.ds(dc, wo), :]
            for rd in rel_drs:
                pieces.append(win if span == 0 else win[rd:rd + tro])
        patch = jnp.concatenate(pieces, axis=-1).reshape(m, 9 * cpi)

        # Single dot: K = 9*cpi (dense), f32 accumulation on the MXU, acc touched once.
        out = jnp.dot(patch, w_ref[...], preferred_element_type=jnp.float32)
        out = out + b_ref[...]                      # folded-BN bias: one VPU pass
        if has_residual:
            out = out + r_ref[0].reshape(m, cpo).astype(jnp.float32)
        if relu:
            out = jnp.maximum(out, 0.0)
        o_ref[...] = out.reshape(1, tro, wo, cpo).astype(o_ref.dtype)

        if emit_shortcut:
            # Fused 1x1 / stride-s shortcut conv (BN scale folded): its input is
            # exactly the center-tap slice already loaded for the patch.
            center = pieces[center_pos].reshape(m, cpi)
            sc = jnp.dot(center, wsc_ref[...], preferred_element_type=jnp.float32)
            osc_ref[...] = sc.reshape(1, tro, wo, cpo).astype(osc_ref.dtype)

    return kernel


# ----------------------------------------------------------------------------
# Host-side glue (cheap single-pass rearrangements, no im2col inflation)
# ----------------------------------------------------------------------------
def _pick_row_tile(ho, wo, target_rows=256):
    # TODO(synk): cdiv + masked last tile for ho with no good divisor (e.g. 7/14/28),
    # keeping m near 256 and wo padded to a multiple of 8.
    best = 1
    for cand in range(1, ho + 1):
        if ho % cand == 0 and cand * wo <= target_rows:
            best = cand
    return best


def _phase_split(xp, s):
    """Pixel-unshuffle the spatially padded NHWC input so every tap of a stride-`s`
    3x3 conv becomes a plain contiguous slice inside the kernel."""
    if s == 1:
        return xp[:, None]
    n, hp, wp, c = xp.shape
    pad_h, pad_w = (-hp) % s, (-wp) % s
    if pad_h or pad_w:
        xp = jnp.pad(xp, ((0, 0), (0, pad_h), (0, pad_w), (0, 0)))
        hp, wp = hp + pad_h, wp + pad_w
    xp = xp.reshape(n, hp // s, s, wp // s, s, c)
    xp = jnp.transpose(xp, (0, 2, 4, 1, 3, 5))
    return xp.reshape(n, s * s, hp // s, wp // s, c)


def conv3x3_bn(xc, w9, bias, *, stride, relu, out_dtype,
               residual=None, w_shortcut=None):
    """3x3 conv (pad=1, stride) + folded BN, optionally fused with:
      * residual:   (N, Ho, Wo, CPout) bf16, added before ReLU (identity / shortcut path)
      * w_shortcut: (CPin, CPout) bf16 1x1 stride-s shortcut conv (BN scale folded),
                    emitted as a SECOND bf16 output computed from the same VMEM-resident input.
    """
    n, h, w, cpin = xc.shape
    cpout = w9.shape[-1]
    ho = (h - 1) // stride + 1
    wo = (w - 1) // stride + 1

    groups, order, center_pos = _plan_tap_groups(stride)
    # Permute taps to the group/concat order and flatten -> one (9*cpin, cpout) matrix.
    w_flat = jnp.concatenate([w9[k] for k in order], axis=0)

    xp = jnp.pad(xc, ((0, 0), (1, 1), (1, 1), (0, 0)))       # 3x3 halo
    xph = _phase_split(xp, stride)                            # (N, s*s, ph_h, ph_w, CPin)
    _, n_ph, ph_h, ph_w, _ = xph.shape
    xph = xph.reshape(n * n_ph, ph_h, ph_w, cpin)

    tro = _pick_row_tile(ho, wo)
    grid = (n, ho // tro)

    in_specs = [
        # whole phase-split sample stays VMEM-resident across its row tiles
        pl.BlockSpec((n_ph, ph_h, ph_w, cpin), lambda i, t: (i, 0, 0, 0)),
        pl.BlockSpec((9 * cpin, cpout), lambda i, t: (0, 0)),   # weights resident
        pl.BlockSpec((1, cpout), lambda i, t: (0, 0)),          # bias resident
    ]
    args = [xph, w_flat, bias]
    if residual is not None:
        assert residual.shape[-1] == cpout, "residual channel padding must match output"
        in_specs.append(pl.BlockSpec((1, tro, wo, cpout), lambda i, t: (i, t, 0, 0)))
        args.append(residual)
    if w_shortcut is not None:
        in_specs.append(pl.BlockSpec((cpin, cpout), lambda i, t: (0, 0)))
        args.append(w_shortcut)

    out_block = pl.BlockSpec((1, tro, wo, cpout), lambda i, t: (i, t, 0, 0))
    if w_shortcut is not None:
        out_shape = (jax.ShapeDtypeStruct((n, ho, wo, cpout), out_dtype),
                     jax.ShapeDtypeStruct((n, ho, wo, cpout), out_dtype))
        out_specs = (out_block, out_block)
    else:
        out_shape = jax.ShapeDtypeStruct((n, ho, wo, cpout), out_dtype)
        out_specs = out_block

    kernel = _make_conv_kernel(groups, center_pos, relu=relu,
                               has_residual=residual is not None,
                               emit_shortcut=w_shortcut is not None)

    # TODO(synk): single-buffer the grid-invariant blocks (input/weights/bias/wsc) with
    # pipeline_mode=pl.Buffered(1) once confirmed on the target jax build; only matters
    # for 512-channel layers against v7x's 64 MiB VMEM.
    return pl.pallas_call(
        kernel,
        out_shape=out_shape,
        grid=grid,
        in_specs=in_specs,
        out_specs=out_specs,
        compiler_params=pltpu.CompilerParams(
            dimension_semantics=("parallel", "parallel"),
            vmem_limit_bytes=_vmem_limit_bytes()),
    )(*args)


# ----------------------------------------------------------------------------
# Parameter prep: fold inference-mode BN into weights / bias, pad channels to 128
# ----------------------------------------------------------------------------
def fold_bn(gamma, beta, running_mean, running_var, eps=1e-5):
    scale = gamma / jnp.sqrt(running_var + eps)
    bias = beta - running_mean * scale
    return scale, bias


def _prep_w3x3(w_oihw, bn_scale, cpin, cpout):
    cout, cin = w_oihw.shape[:2]
    w = jnp.transpose(w_oihw, (2, 3, 1, 0)) * bn_scale[None, None, None, :]
    w = jnp.pad(w, ((0, 0), (0, 0), (0, cpin - cin), (0, cpout - cout)))
    return w.reshape(9, cpin, cpout).astype(jnp.bfloat16)


def _prep_w1x1(w_oihw, bn_scale, cpin, cpout):
    cout, cin = w_oihw.shape[:2]
    w = jnp.transpose(w_oihw[:, :, 0, 0], (1, 0)) * bn_scale[None, :]
    w = jnp.pad(w, ((0, cpin - cin), (0, cpout - cout)))
    return w.astype(jnp.bfloat16)


def _pad_bias(b, cp):
    return jnp.pad(b, (0, cp - b.shape[0])).reshape(1, cp).astype(jnp.float32)


# ----------------------------------------------------------------------------
# The Basic block (forward semantics of the PyTorch module, inference-mode BN)
# ----------------------------------------------------------------------------
def basic_block_forward(x_nchw, params, *, in_planes, planes, stride):
    flag = (stride != 1) or (in_planes != planes)
    cpi = _round_up(in_planes, LANE)
    cpo = _round_up(planes, LANE)

    # NCHW -> NHWC (channels on the lane axis) + channel pad, bf16 activations.
    # TODO(synk): keep the whole network NHWC / channel-padded end-to-end to drop
    # these boundary transposes & pads entirely.
    x = jnp.transpose(x_nchw, (0, 2, 3, 1)).astype(jnp.bfloat16)
    xc = jnp.pad(x, ((0, 0), (0, 0), (0, 0), (0, cpi - in_planes)))

    s1, b1 = fold_bn(*params["bn1"])
    s2, b2 = fold_bn(*params["bn2"])
    w1 = _prep_w3x3(params["w1"], s1, cpi, cpo)
    w2 = _prep_w3x3(params["w2"], s2, cpo, cpo)
    bias1 = _pad_bias(b1, cpo)

    if flag:
        ssc, bsc = fold_bn(*params["bn_sc"])
        wsc = _prep_w1x1(params["w_sc"], ssc, cpi, cpo)
        bias2 = _pad_bias(b2 + bsc, cpo)              # both biases add pre-ReLU
        # conv1 + BN + ReLU, with the 1x1/stride-s shortcut conv fused in as a
        # second bf16 output (no XLA strided-gather residual tensor).
        y1, residual = conv3x3_bn(xc, w1, bias1, stride=stride, relu=True,
                                  out_dtype=jnp.bfloat16, w_shortcut=wsc)
    else:
        assert cpi == cpo, "identity residual requires matching channel padding"
        bias2 = _pad_bias(b2, cpo)
        y1 = conv3x3_bn(xc, w1, bias1, stride=stride, relu=True,
                        out_dtype=jnp.bfloat16)
        residual = xc                                 # identity

    # conv2 + BN + residual add + ReLU, all in one fused kernel; bf16 writeback.
    y2 = conv3x3_bn(y1, w2, bias2, stride=1, relu=True, out_dtype=jnp.bfloat16,
                    residual=residual)

    out = y2[:, :, :, :planes]                        # drop channel padding
    return jnp.transpose(out, (0, 3, 1, 2)).astype(jnp.float32)   # NHWC -> NCHW


# ----------------------------------------------------------------------------
# Pure-JAX reference (XLA convs) for the correctness check
# ----------------------------------------------------------------------------
def _ref_conv(x_nchw, w_oihw, stride, pad):
    return lax.conv_general_dilated(
        x_nchw, w_oihw, window_strides=(stride, stride),
        padding=((pad, pad), (pad, pad)),
        dimension_numbers=("NCHW", "OIHW", "NCHW"))


def basic_block_reference(x_nchw, params, *, in_planes, planes, stride):
    flag = (stride != 1) or (in_planes != planes)

    def bn(y, p):
        g, b, m, v = p
        sh = (1, -1, 1, 1)
        return (y - m.reshape(sh)) / jnp.sqrt(v.reshape(sh) + 1e-5) * g.reshape(sh) + b.reshape(sh)

    out = jnp.maximum(bn(_ref_conv(x_nchw, params["w1"], stride, 1), params["bn1"]), 0.0)
    out = bn(_ref_conv(out, params["w2"], 1, 1), params["bn2"])
    x = x_nchw
    if flag:
        x = bn(_ref_conv(x_nchw, params["w_sc"], stride, 0), params["bn_sc"])
    return jnp.maximum(out + x, 0.0)


# ----------------------------------------------------------------------------
def init_params(key, in_planes, planes):
    ks = jax.random.split(key, 12)

    def bn_params(k, c):
        k1, k2, k3, k4 = jax.random.split(k, 4)
        gamma = 1.0 + 0.1 * jax.random.normal(k1, (c,), jnp.float32)
        beta = 0.1 * jax.random.normal(k2, (c,), jnp.float32)
        rmean = 0.1 * jax.random.normal(k3, (c,), jnp.float32)
        rvar = 1.0 + 0.1 * jax.random.uniform(k4, (c,), jnp.float32)
        return (gamma, beta, rmean, rvar)

    return {
        "w1": 0.1 * jax.random.normal(ks[0], (planes, in_planes, 3, 3), jnp.float32),
        "bn1": bn_params(ks[1], planes),
        "w2": 0.1 * jax.random.normal(ks[2], (planes, planes, 3, 3), jnp.float32),
        "bn2": bn_params(ks[3], planes),
        "w_sc": 0.1 * jax.random.normal(ks[4], (planes, in_planes, 1, 1), jnp.float32),
        "bn_sc": bn_params(ks[5], planes),
    }


if __name__ == "__main__":
    key = jax.random.PRNGKey(0)

    # (in_planes, planes, stride): projection-shortcut block and identity-shortcut block.
    configs = [(4, 8, 2), (8, 8, 1)]
    for idx, (in_planes, planes, stride) in enumerate(configs):
        kx, kp = jax.random.split(jax.random.fold_in(key, idx))
        x = jax.random.normal(kx, (2, in_planes, 16, 16), jnp.float32)   # NCHW like PyTorch
        params = init_params(kp, in_planes, planes)

        fwd = jax.jit(functools.partial(basic_block_forward, in_planes=in_planes,
                                        planes=planes, stride=stride))
        out = jax.block_until_ready(fwd(x, params))

        ref = basic_block_reference(x, params, in_planes=in_planes,
                                    planes=planes, stride=stride)
        assert out.shape == ref.shape, (out.shape, ref.shape)
        max_err = float(jnp.max(jnp.abs(out - ref)))
        mean_err = float(jnp.mean(jnp.abs(out - ref)))
        # bf16 operands, bf16 intermediate activation AND bf16 final writeback
        # -> loose-but-meaningful tolerance
        assert max_err < 1e-1, (idx, max_err)
        assert mean_err < 2e-2, (idx, mean_err)

    print("KERNEL_OK")
</pallas_src>

<mosaic_0001>
module attributes {stable_mosaic.version = 11 : i64} {
  func.func @kernel(%arg0: i32, %arg1: i32, %arg2: memref<4x9x9x128xbf16, #tpu.memory_space<vmem>>, %arg3: memref<1152x128xbf16, #tpu.memory_space<vmem>>, %arg4: memref<1x128xf32, #tpu.memory_space<vmem>>, %arg5: memref<128x128xbf16, #tpu.memory_space<vmem>>, %arg6: memref<1x8x8x128xbf16, #tpu.memory_space<vmem>>, %arg7: memref<1x8x8x128xbf16, #tpu.memory_space<vmem>>) attributes {dimension_semantics = [#tpu.dimension_semantics<parallel>, #tpu.dimension_semantics<parallel>], iteration_bounds = array<i64: 2, 1>, scalar_prefetch = 0 : i64, scratch_operands = 0 : i64, tpu.core_type = #tpu.core_type<tc>, window_params = [{transform_indices = @transform_0, window_bounds = array<i64: 4, 9, 9, 128>}, {pipeline_mode = #tpu.pipeline_mode<synchronous>, transform_indices = @transform_1, window_bounds = array<i64: 1152, 128>}, {pipeline_mode = #tpu.pipeline_mode<synchronous>, transform_indices = @transform_2, window_bounds = array<i64: 1, 128>}, {pipeline_mode = #tpu.pipeline_mode<synchronous>, transform_indices = @transform_3, window_bounds = array<i64: 128, 128>}, {transform_indices = @transform_4, window_bounds = array<i64: 1, 8, 8, 128>}, {transform_indices = @transform_5, window_bounds = array<i64: 1, 8, 8, 128>}]} {
    %c8_i32 = arith.constant 8 : i32
    %0 = arith.muli %arg1, %c8_i32 : i32
    %c0_i32 = arith.constant 0 : i32
    %1 = arith.addi %0, %c0_i32 : i32
    %c0 = arith.constant 0 : index
    %2 = arith.index_cast %1 : i32 to index
    %c0_0 = arith.constant 0 : index
    %c0_1 = arith.constant 0 : index
    %3 = vector.load %arg2[%c0, %2, %c0_0, %c0_1] : memref<4x9x9x128xbf16, #tpu.memory_space<vmem>>, vector<1x9x8x128xbf16>
    %4 = vector.shape_cast %3 : vector<1x9x8x128xbf16> to vector<9x8x128xbf16>
    %5 = vector.extract_strided_slice %4 {offsets = [0, 0, 0], sizes = [8, 8, 128], strides = [1, 1, 1]} : vector<9x8x128xbf16> to vector<8x8x128xbf16>
    %6 = vector.extract_strided_slice %4 {offsets = [1, 0, 0], sizes = [8, 8, 128], strides = [1, 1, 1]} : vector<9x8x128xbf16> to vector<8x8x128xbf16>
    %c8_i32_2 = arith.constant 8 : i32
    %7 = arith.muli %arg1, %c8_i32_2 : i32
    %c0_i32_3 = arith.constant 0 : i32
    %8 = arith.addi %7, %c0_i32_3 : i32
    %c0_4 = arith.constant 0 : index
    %9 = arith.index_cast %8 : i32 to index
    %c1 = arith.constant 1 : index
    %c0_5 = arith.constant 0 : index
    %10 = vector.load %arg2[%c0_4, %9, %c1, %c0_5] : memref<4x9x9x128xbf16, #tpu.memory_space<vmem>>, vector<1x9x8x128xbf16>
    %11 = vector.shape_cast %10 : vector<1x9x8x128xbf16> to vector<9x8x128xbf16>
    %12 = vector.extract_strided_slice %11 {offsets = [0, 0, 0], sizes = [8, 8, 128], strides = [1, 1, 1]} : vector<9x8x128xbf16> to vector<8x8x128xbf16>
    %13 = vector.extract_strided_slice %11 {offsets = [1, 0, 0], sizes = [8, 8, 128], strides = [1, 1, 1]} : vector<9x8x128xbf16> to vector<8x8x128xbf16>
    %c8_i32_6 = arith.constant 8 : i32
    %14 = arith.muli %arg1, %c8_i32_6 : i32
    %c0_i32_7 = arith.constant 0 : i32
    %15 = arith.addi %14, %c0_i32_7 : i32
    %c1_8 = arith.constant 1 : index
    %16 = arith.index_cast %15 : i32 to index
    %c0_9 = arith.constant 0 : index
    %c0_10 = arith.constant 0 : index
    %17 = vector.load %arg2[%c1_8, %16, %c0_9, %c0_10] : memref<4x9x9x128xbf16, #tpu.memory_space<vmem>>, vector<1x9x8x128xbf16>
    %18 = vector.shape_cast %17 : vector<1x9x8x128xbf16> to vector<9x8x128xbf16>
    %19 = vector.extract_strided_slice %18 {offsets = [0, 0, 0], sizes = [8, 8, 128], strides = [1, 1, 1]} : vector<9x8x128xbf16> to vector<8x8x128xbf16>
    %20 = vector.extract_strided_slice %18 {offsets = [1, 0, 0], sizes = [8, 8, 128], strides = [1, 1, 1]} : vector<9x8x128xbf16> to vector<8x8x128xbf16>
    %c8_i32_11 = arith.constant 8 : i32
    %21 = arith.muli %arg1, %c8_i32_11 : i32
    %c0_i32_12 = arith.constant 0 : i32
    %22 = arith.addi %21, %c0_i32_12 : i32
    %c2 = arith.constant 2 : index
    %23 = arith.index_cast %22 : i32 to index
    %c0_13 = arith.constant 0 : index
    %c0_14 = arith.constant 0 : index
    %24 = vector.load %arg2[%c2, %23, %c0_13, %c0_14] : memref<4x9x9x128xbf16, #tpu.memory_space<vmem>>, vector<1x8x8x128xbf16>
    %25 = vector.shape_cast %24 : vector<1x8x8x128xbf16> to vector<8x8x128xbf16>
    %c8_i32_15 = arith.constant 8 : i32
    %26 = arith.muli %arg1, %c8_i32_15 : i32
    %c0_i32_16 = arith.constant 0 : i32
    %27 = arith.addi %26, %c0_i32_16 : i32
    %c2_17 = arith.constant 2 : index
    %28 = arith.index_cast %27 : i32 to index
    %c1_18 = arith.constant 1 : index
    %c0_19 = arith.constant 0 : index
    %29 = vector.load %arg2[%c2_17, %28, %c1_18, %c0_19] : memref<4x9x9x128xbf16, #tpu.memory_space<vmem>>, vector<1x8x8x128xbf16>
    %30 = vector.shape_cast %29 : vector<1x8x8x128xbf16> to vector<8x8x128xbf16>
    %c8_i32_20 = arith.constant 8 : i32
    %31 = arith.muli %arg1, %c8_i32_20 : i32
    %c0_i32_21 = arith.constant 0 : i32
    %32 = arith.addi %31, %c0_i32_21 : i32
    %c3 = arith.constant 3 : index
    %33 = arith.index_cast %32 : i32 to index
    %c0_22 = arith.constant 0 : index
    %c0_23 = arith.constant 0 : index
    %34 = vector.load %arg2[%c3, %33, %c0_22, %c0_23] : memref<4x9x9x128xbf16, #tpu.memory_space<vmem>>, vector<1x8x8x128xbf16>
    %35 = vector.shape_cast %34 : vector<1x8x8x128xbf16> to vector<8x8x128xbf16>
    %36 = tpu.concatenate %5, %6, %12, %13, %19, %20, %25, %30, %35 in 2 : vector<8x8x128xbf16>, vector<8x8x128xbf16>, vector<8x8x128xbf16>, vector<8x8x128xbf16>, vector<8x8x128xbf16>, vector<8x8x128xbf16>, vector<8x8x128xbf16>, vector<8x8x128xbf16>, vector<8x8x128xbf16> -> vector<8x8x1152xbf16>
    %37 = vector.shape_cast %36 : vector<8x8x1152xbf16> to vector<64x1152xbf16>
    %c0_24 = arith.constant 0 : index
    %c0_25 = arith.constant 0 : index
    %38 = vector.load %arg3[%c0_24, %c0_25] : memref<1152x128xbf16, #tpu.memory_space<vmem>>, vector<1152x128xbf16>
    %cst = arith.constant dense<0.000000e+00> : vector<64x128xf32>
    %39 = tpu.matmul %37, %38, %cst {dimension_numbers = #tpu.dot_dimension_numbers<[1], [0], [0], [1], [0, 0, 1, 1], [], []>} : vector<64x1152xbf16>, vector<1152x128xbf16>, vector<64x128xf32> -> vector<64x128xf32>
    %c0_26 = arith.constant 0 : index
    %c0_27 = arith.constant 0 : index
    %40 = vector.load %arg4[%c0_26, %c0_27] : memref<1x128xf32, #tpu.memory_space<vmem>>, vector<1x128xf32>
    %41 = vector.broadcast %40 : vector<1x128xf32> to vector<64x128xf32>
    %42 = arith.addf %39, %41 : vector<64x128xf32>
    %cst_28 = arith.constant 0.000000e+00 : f32
    %43 = vector.broadcast %cst_28 : f32 to vector<64x128xf32>
    %44 = arith.maximumf %42, %43 : vector<64x128xf32>
    %45 = vector.shape_cast %44 : vector<64x128xf32> to vector<1x8x8x128xf32>
    %46 = arith.truncf %45 : vector<1x8x8x128xf32> to vector<1x8x8x128xbf16>
    %c0_29 = arith.constant 0 : index
    %c0_30 = arith.constant 0 : index
    %c0_31 = arith.constant 0 : index
    %c0_32 = arith.constant 0 : index
    %47 = vector.load %arg6[%c0_29, %c0_30, %c0_31, %c0_32] : memref<1x8x8x128xbf16, #tpu.memory_space<vmem>>, vector<1x8x8x128xbf16>
    tpu.vector_store %arg6[%c0_29, %c0_30, %c0_31, %c0_32], %46 {strides = array<i32>} : memref<1x8x8x128xbf16, #tpu.memory_space<vmem>>, vector<1x8x8x128xbf16>,
    %48 = vector.shape_cast %35 : vector<8x8x128xbf16> to vector<64x128xbf16>
    %c0_33 = arith.constant 0 : index
    %c0_34 = arith.constant 0 : index
    %49 = vector.load %arg5[%c0_33, %c0_34] : memref<128x128xbf16, #tpu.memory_space<vmem>>, vector<128x128xbf16>
    %cst_35 = arith.constant dense<0.000000e+00> : vector<64x128xf32>
    %50 = tpu.matmul %48, %49, %cst_35 {dimension_numbers = #tpu.dot_dimension_numbers<[1], [0], [0], [1], [0, 0, 1, 1], [], []>} : vector<64x128xbf16>, vector<128x128xbf16>, vector<64x128xf32> -> vector<64x128xf32>
    %51 = vector.shape_cast %50 : vector<64x128xf32> to vector<1x8x8x128xf32>
    %52 = arith.truncf %51 : vector<1x8x8x128xf32> to vector<1x8x8x128xbf16>
    %c0_36 = arith.constant 0 : index
    %c0_37 = arith.constant 0 : index
    %c0_38 = arith.constant 0 : index
    %c0_39 = arith.constant 0 : index
    %53 = vector.load %arg7[%c0_36, %c0_37, %c0_38, %c0_39] : memref<1x8x8x128xbf16, #tpu.memory_space<vmem>>, vector<1x8x8x128xbf16>
    tpu.vector_store %arg7[%c0_36, %c0_37, %c0_38, %c0_39], %52 {strides = array<i32>} : memref<1x8x8x128xbf16, #tpu.memory_space<vmem>>, vector<1x8x8x128xbf16>,
    return
  }
  func.func @transform_0(%arg0: i32, %arg1: i32) -> (i32, i32, i32, i32) {
    %c0_i32 = arith.constant 0 : i32
    %c0_i32_0 = arith.constant 0 : i32
    %c0_i32_1 = arith.constant 0 : i32
    %c0_i32_2 = arith.constant 0 : i32
    return %arg0, %c0_i32, %c0_i32_0, %c0_i32_1 : i32, i32, i32, i32
  }
  func.func @transform_1(%arg0: i32, %arg1: i32) -> (i32, i32) {
    %c0_i32 = arith.constant 0 : i32
    %c0_i32_0 = arith.constant 0 : i32
    %c0_i32_1 = arith.constant 0 : i32
    return %c0_i32, %c0_i32_0 : i32, i32
  }
  func.func @transform_2(%arg0: i32, %arg1: i32) -> (i32, i32) {
    %c0_i32 = arith.constant 0 : i32
    %c0_i32_0 = arith.constant 0 : i32
    %c0_i32_1 = arith.constant 0 : i32
    return %c0_i32, %c0_i32_0 : i32, i32
  }
  func.func @transform_3(%arg0: i32, %arg1: i32) -> (i32, i32) {
    %c0_i32 = arith.constant 0 : i32
    %c0_i32_0 = arith.constant 0 : i32
    %c0_i32_1 = arith.constant 0 : i32
    return %c0_i32, %c0_i32_0 : i32, i32
  }
  func.func @transform_4(%arg0: i32, %arg1: i32) -> (i32, i32, i32, i32) {
    %c0_i32 = arith.constant 0 : i32
    %c0_i32_0 = arith.constant 0 : i32
    %c0_i32_1 = arith.constant 0 : i32
    return %arg0, %arg1, %c0_i32, %c0_i32_0 : i32, i32, i32, i32
  }
  func.func @transform_5(%arg0: i32, %arg1: i32) -> (i32, i32, i32, i32) {
    %c0_i32 = arith.constant 0 : i32
    %c0_i32_0 = arith.constant 0 : i32
    %c0_i32_1 = arith.constant 0 : i32
    return %arg0, %arg1, %c0_i32, %c0_i32_0 : i32, i32, i32, i32
  }
}

module attributes {stable_mosaic.version = 11 : i64} {
  func.func @kernel(%arg0: i32, %arg1: i32, %arg2: memref<1x10x10x128xbf16, #tpu.memory_space<vmem>>, %arg3: memref<1152x128xbf16, #tpu.memory_space<vmem>>, %arg4: memref<1x128xf32, #tpu.memory_space<vmem>>, %arg5: memref<1x8x8x128xbf16, #tpu.memory_space<vmem>>, %arg6: memref<1x8x8x128xbf16, #tpu.memory_space<vmem>>) attributes {dimension_semantics = [#tpu.dimension_semantics<parallel>, #tpu.dimension_semantics<parallel>], iteration_bounds = array<i64: 2, 1>, scalar_prefetch = 0 : i64, scratch_operands = 0 : i64, tpu.core_type = #tpu.core_type<tc>, window_params = [{transform_indices = @transform_0, window_bounds = array<i64: 1, 10, 10, 128>}, {pipeline_mode = #tpu.pipeline_mode<synchronous>, transform_indices = @transform_1, window_bounds = array<i64: 1152, 128>}, {pipeline_mode = #tpu.pipeline_mode<synchronous>, transform_indices = @transform_2, window_bounds = array<i64: 1, 128>}, {transform_indices = @transform_3, window_bounds = array<i64: 1, 8, 8, 128>}, {transform_indices = @transform_4, window_bounds = array<i64: 1, 8, 8, 128>}]} {
    %c8_i32 = arith.constant 8 : i32
    %0 = arith.muli %arg1, %c8_i32 : i32
    %c0_i32 = arith.constant 0 : i32
    %1 = arith.addi %0, %c0_i32 : i32
    %c0 = arith.constant 0 : index
    %2 = arith.index_cast %1 : i32 to index
    %c0_0 = arith.constant 0 : index
    %c0_1 = arith.constant 0 : index
    %3 = vector.load %arg2[%c0, %2, %c0_0, %c0_1] : memref<1x10x10x128xbf16, #tpu.memory_space<vmem>>, vector<1x10x8x128xbf16>
    %4 = vector.shape_cast %3 : vector<1x10x8x128xbf16> to vector<10x8x128xbf16>
    %5 = vector.extract_strided_slice %4 {offsets = [0, 0, 0], sizes = [8, 8, 128], strides = [1, 1, 1]} : vector<10x8x128xbf16> to vector<8x8x128xbf16>
    %6 = vector.extract_strided_slice %4 {offsets = [1, 0, 0], sizes = [8, 8, 128], strides = [1, 1, 1]} : vector<10x8x128xbf16> to vector<8x8x128xbf16>
    %7 = vector.extract_strided_slice %4 {offsets = [2, 0, 0], sizes = [8, 8, 128], strides = [1, 1, 1]} : vector<10x8x128xbf16> to vector<8x8x128xbf16>
    %c8_i32_2 = arith.constant 8 : i32
    %8 = arith.muli %arg1, %c8_i32_2 : i32
    %c0_i32_3 = arith.constant 0 : i32
    %9 = arith.addi %8, %c0_i32_3 : i32
    %c0_4 = arith.constant 0 : index
    %10 = arith.index_cast %9 : i32 to index
    %c1 = arith.constant 1 : index
    %c0_5 = arith.constant 0 : index
    %11 = vector.load %arg2[%c0_4, %10, %c1, %c0_5] : memref<1x10x10x128xbf16, #tpu.memory_space<vmem>>, vector<1x10x8x128xbf16>
    %12 = vector.shape_cast %11 : vector<1x10x8x128xbf16> to vector<10x8x128xbf16>
    %13 = vector.extract_strided_slice %12 {offsets = [0, 0, 0], sizes = [8, 8, 128], strides = [1, 1, 1]} : vector<10x8x128xbf16> to vector<8x8x128xbf16>
    %14 = vector.extract_strided_slice %12 {offsets = [1, 0, 0], sizes = [8, 8, 128], strides = [1, 1, 1]} : vector<10x8x128xbf16> to vector<8x8x128xbf16>
    %15 = vector.extract_strided_slice %12 {offsets = [2, 0, 0], sizes = [8, 8, 128], strides = [1, 1, 1]} : vector<10x8x128xbf16> to vector<8x8x128xbf16>
    %c8_i32_6 = arith.constant 8 : i32
    %16 = arith.muli %arg1, %c8_i32_6 : i32
    %c0_i32_7 = arith.constant 0 : i32
    %17 = arith.addi %16, %c0_i32_7 : i32
    %c0_8 = arith.constant 0 : index
    %18 = arith.index_cast %17 : i32 to index
    %c2 = arith.constant 2 : index
    %c0_9 = arith.constant 0 : index
    %19 = vector.load %arg2[%c0_8, %18, %c2, %c0_9] : memref<1x10x10x128xbf16, #tpu.memory_space<vmem>>, vector<1x10x8x128xbf16>
    %20 = vector.shape_cast %19 : vector<1x10x8x128xbf16> to vector<10x8x128xbf16>
    %21 = vector.extract_strided_slice %20 {offsets = [0, 0, 0], sizes = [8, 8, 128], strides = [1, 1, 1]} : vector<10x8x128xbf16> to vector<8x8x128xbf16>
    %22 = vector.extract_strided_slice %20 {offsets = [1, 0, 0], sizes = [8, 8, 128], strides = [1, 1, 1]} : vector<10x8x128xbf16> to vector<8x8x128xbf16>
    %23 = vector.extract_strided_slice %20 {offsets = [2, 0, 0], sizes = [8, 8, 128], strides = [1, 1, 1]} : vector<10x8x128xbf16> to vector<8x8x128xbf16>
    %24 = tpu.concatenate %5, %6, %7, %13, %14, %15, %21, %22, %23 in 2 : vector<8x8x128xbf16>, vector<8x8x128xbf16>, vector<8x8x128xbf16>, vector<8x8x128xbf16>, vector<8x8x128xbf16>, vector<8x8x128xbf16>, vector<8x8x128xbf16>, vector<8x8x128xbf16>, vector<8x8x128xbf16> -> vector<8x8x1152xbf16>
    %25 = vector.shape_cast %24 : vector<8x8x1152xbf16> to vector<64x1152xbf16>
    %c0_10 = arith.constant 0 : index
    %c0_11 = arith.constant 0 : index
    %26 = vector.load %arg3[%c0_10, %c0_11] : memref<1152x128xbf16, #tpu.memory_space<vmem>>, vector<1152x128xbf16>
    %cst = arith.constant dense<0.000000e+00> : vector<64x128xf32>
    %27 = tpu.matmul %25, %26, %cst {dimension_numbers = #tpu.dot_dimension_numbers<[1], [0], [0], [1], [0, 0, 1, 1], [], []>} : vector<64x1152xbf16>, vector<1152x128xbf16>, vector<64x128xf32> -> vector<64x128xf32>
    %c0_12 = arith.constant 0 : index
    %c0_13 = arith.constant 0 : index
    %28 = vector.load %arg4[%c0_12, %c0_13] : memref<1x128xf32, #tpu.memory_space<vmem>>, vector<1x128xf32>
    %29 = vector.broadcast %28 : vector<1x128xf32> to vector<64x128xf32>
    %30 = arith.addf %27, %29 : vector<64x128xf32>
    %c0_14 = arith.constant 0 : index
    %c0_15 = arith.constant 0 : index
    %c0_16 = arith.constant 0 : index
    %c0_17 = arith.constant 0 : index
    %31 = vector.load %arg5[%c0_14, %c0_15, %c0_16, %c0_17] : memref<1x8x8x128xbf16, #tpu.memory_space<vmem>>, vector<1x8x8x128xbf16>
    %32 = vector.shape_cast %31 : vector<1x8x8x128xbf16> to vector<8x8x128xbf16>
    %33 = vector.shape_cast %32 : vector<8x8x128xbf16> to vector<64x128xbf16>
    %34 = arith.extf %33 : vector<64x128xbf16> to vector<64x128xf32>
    %35 = arith.addf %30, %34 : vector<64x128xf32>
    %cst_18 = arith.constant 0.000000e+00 : f32
    %36 = vector.broadcast %cst_18 : f32 to vector<64x128xf32>
    %37 = arith.maximumf %35, %36 : vector<64x128xf32>
    %38 = vector.shape_cast %37 : vector<64x128xf32> to vector<1x8x8x128xf32>
    %39 = arith.truncf %38 : vector<1x8x8x128xf32> to vector<1x8x8x128xbf16>
    %c0_19 = arith.constant 0 : index
    %c0_20 = arith.constant 0 : index
    %c0_21 = arith.constant 0 : index
    %c0_22 = arith.constant 0 : index
    %40 = vector.load %arg6[%c0_19, %c0_20, %c0_21, %c0_22] : memref<1x8x8x128xbf16, #tpu.memory_space<vmem>>, vector<1x8x8x128xbf16>
    tpu.vector_store %arg6[%c0_19, %c0_20, %c0_21, %c0_22], %39 {strides = array<i32>} : memref<1x8x8x128xbf16, #tpu.memory_space<vmem>>, vector<1x8x8x128xbf16>,
    return
  }
  func.func @transform_0(%arg0: i32, %arg1: i32) -> (i32, i32, i32, i32) {
    %c0_i32 = arith.constant 0 : i32
    %c0_i32_0 = arith.constant 0 : i32
    %c0_i32_1 = arith.constant 0 : i32
    %c0_i32_2 = arith.constant 0 : i32
    return %arg0, %c0_i32, %c0_i32_0, %c0_i32_1 : i32, i32, i32, i32
  }
  func.func @transform_1(%arg0: i32, %arg1: i32) -> (i32, i32) {
    %c0_i32 = arith.constant 0 : i32
    %c0_i32_0 = arith.constant 0 : i32
    %c0_i32_1 = arith.constant 0 : i32
    return %c0_i32, %c0_i32_0 : i32, i32
  }
  func.func @transform_2(%arg0: i32, %arg1: i32) -> (i32, i32) {
    %c0_i32 = arith.constant 0 : i32
    %c0_i32_0 = arith.constant 0 : i32
    %c0_i32_1 = arith.constant 0 : i32
    return %c0_i32, %c0_i32_0 : i32, i32
  }
  func.func @transform_3(%arg0: i32, %arg1: i32) -> (i32, i32, i32, i32) {
    %c0_i32 = arith.constant 0 : i32
    %c0_i32_0 = arith.constant 0 : i32
    %c0_i32_1 = arith.constant 0 : i32
    return %arg0, %arg1, %c0_i32, %c0_i32_0 : i32, i32, i32, i32
  }
  func.func @transform_4(%arg0: i32, %arg1: i32) -> (i32, i32, i32, i32) {
    %c0_i32 = arith.constant 0 : i32
    %c0_i32_0 = arith.constant 0 : i32
    %c0_i32_1 = arith.constant 0 : i32
    return %arg0, %arg1, %c0_i32, %c0_i32_0 : i32, i32, i32, i32
  }
}

</mosaic_0001>

<bundles_post_ra>
// kernel: basic_block_forward.2
= control target key start
LH: loop header
LB: loop body
LE: loop exit
PB: predicated region body
PF: predicated region fallthrough
CT: control target
= control target key end

     0   :  { %s2551_s18 = smov 0   ;;  %s2553_s19 = smov 0   ;;  %s2901_s0 = inlined_call_operand.vmem [shape: bf16[8,9,9,128], index: 0, kind: input, shape index: {}]   ;;  %s2902_s1 = inlined_call_operand.vmem [shape: bf16[1152,128], index: 1, kind: input, shape index: {}]   ;;  %s2903_s2 = inlined_call_operand.vmem [shape: f32[1,128], index: 2, kind: input, shape index: {}]   ;;  %s2904_s3 = inlined_call_operand.vmem [shape: bf16[128,128], index: 3, kind: input, shape index: {}]   ;;  %s2905_s4 = inlined_call_operand.vmem [shape: bf16[2,8,8,128], index: 4, kind: output, shape index: {0}]   ;;  %s2906_s5 = inlined_call_operand.vmem [shape: bf16[2,8,8,128], index: 5, kind: output, shape index: {1}]  }
   0x1   :  { %s2555_s20 = smov 0  }
   0x2 LB: > { %s28_s21 = sadd.s32 1, %s2515_s19  ;;  %p1895_p0 = scmp.ge.s32.totalorder %s2519_s20, 1  ;;  %s2519_s20 = sphi %s2555_s20, %s16_s20   ;;  %s2515_s19 = sphi %s2553_s19, %s2908_s19   ;;  %s2511_s18 = sphi %s2551_s18, %s2907_s18  }
   0x3   : > { %p30_p1 = scmp.ge.s32.totalorder %s28_s21, 2  ;;  %p208_p2 = scmp.lt.s32.totalorder %s2519_s20, 3 }
   0x5   : > { %s2910_s21 = smov (%p30_p1, %s28_s21), 0  ;;  %p209_p3 = pnand %p1895_p0, %p208_p2 }
   0x6   : > { %v2376_v0 = vld [vmem:[%s2902_s1 + $0x40] sm:$0xff] (!%p209_p3)   ;;  %v2380_v4 = vld [vmem:[%s2902_s1 + $0x48] sm:$0xff] (!%p209_p3)   ;;  %v2384_v8 = vld [vmem:[%s2902_s1 + $0x50] sm:$0xff] (!%p209_p3)   ;;  %s1896_s29 = sshll.u32 (!%p209_p3), %s2511_s18, 2  ;;  %p258_p5 = scmp.lt.s32.totalorder (!%p209_p3), %s2511_s18, 1 }
   0x7   : > { %212 = sbr.rel (%p209_p3) target bundleno = 333 (0x14d), region = 36  ;;  %v2377_v1 = vld [vmem:[%s2902_s1] sm:$0xff] (!%p209_p3)   ;;  %2119 = vmatprep.subr.bf16.mxu0 (!%p209_p3), %v2376_v0  ;;  %v2381_v5 = vld [vmem:[%s2902_s1 + $0x8] sm:$0xff] (!%p209_p3)   ;;  %v2385_v9 = vld [vmem:[%s2902_s1 + $0x10] sm:$0xff] (!%p209_p3)   ;;  %p251_p4 = scmp.lt.s32.totalorder (!%p209_p3), %s1896_s29, 7 }
   0x8   : > { %v2378_v2 = vld [vmem:[%s2902_s1 + $0xc0] sm:$0xff] (!%p209_p3)   ;;  %2120 = vmatpush3.bf16.msra.mxu0 (!%p209_p3), %v2377_v1  ;;  %v2382_v6 = vld [vmem:[%s2902_s1 + $0xc8] sm:$0xff] (!%p209_p3)   ;;  %v2386_v10 = vld [vmem:[%s2902_s1 + $0xd0] sm:$0xff] (!%p209_p3)  }
   0x9   : > { %v2379_v3 = vld [vmem:[%s2902_s1 + $0x80] sm:$0xff] (!%p209_p3)   ;;  %2159 = vmatprep.subr.bf16.mxu1 (!%p209_p3), %v2378_v2  ;;  %2121 = vmatprep.subr.bf16.mxu0 (!%p209_p3), %v2380_v4  ;;  %v2383_v7 = vld [vmem:[%s2902_s1 + $0x88] sm:$0xff] (!%p209_p3)   ;;  %v2387_v11 = vld [vmem:[%s2902_s1 + $0x90] sm:$0xff] (!%p209_p3)  }
   0xa   : > { %2160 = vmatpush3.bf16.msra.mxu1 (!%p209_p3), %v2379_v3  ;;  %v2388_v12 = vld [vmem:[%s2902_s1 + $0x58] sm:$0xff] (!%p209_p3)   ;;  %v2392_v16 = vld [vmem:[%s2902_s1 + $0x60] sm:$0xff] (!%p209_p3)   ;;  %v2396_v20 = vld [vmem:[%s2902_s1 + $0x68] sm:$0xff] (!%p209_p3)  }
   0xb   : > { %2161 = vmatprep.subr.bf16.mxu1 (!%p209_p3), %v2382_v6  ;;  %v2389_v13 = vld [vmem:[%s2902_s1 + $0x18] sm:$0xff] (!%p209_p3)   ;;  %v2393_v17 = vld [vmem:[%s2902_s1 + $0x20] sm:$0xff] (!%p209_p3)   ;;  %v2397_v21 = vld [vmem:[%s2902_s1 + $0x28] sm:$0xff] (!%p209_p3)  }
   0xc   : > { %2122 = vmatpush3.bf16.msra.mxu0 (!%p209_p3), %v2381_v5  ;;  %v2390_v14 = vld [vmem:[%s2902_s1 + $0xd8] sm:$0xff] (!%p209_p3)   ;;  %v2394_v18 = vld [vmem:[%s2902_s1 + $0xe0] sm:$0xff] (!%p209_p3)   ;;  %v2398_v22 = vld [vmem:[%s2902_s1 + $0xe8] sm:$0xff] (!%p209_p3)  }
   0xd   : > { %2123 = vmatprep.subr.bf16.mxu0 (!%p209_p3), %v2384_v8  ;;  %v2391_v15 = vld [vmem:[%s2902_s1 + $0x98] sm:$0xff] (!%p209_p3)   ;;  %v2395_v19 = vld [vmem:[%s2902_s1 + $0xa0] sm:$0xff] (!%p209_p3)   ;;  %v2399_v23 = vld [vmem:[%s2902_s1 + $0xa8] sm:$0xff] (!%p209_p3)  }
   0xe   : > { %2162 = vmatpush3.bf16.msra.mxu1 %v2383_v7  ;;  %s2912_s29 = smov (!%p251_p4, %s1896_s29), 7  ;;  %v2400_v24 = vld [vmem:[%s2902_s1 + $0x70] sm:$0xff]   ;;  %v2404_v28 = vld [vmem:[%s2902_s1 + $0x78] sm:$0xff]   ;;  %v2413_v43 = vld [vmem:[%s2902_s1 + $0x140] sm:$0xff]   ;;  %s2914_s18 = smov (!%p258_p5, %s2511_s18), 1 }
   0xf   : > { %2163 = vmatprep.subr.bf16.mxu1 %v2386_v10  ;;  %s2351_s7 = smul.u32 72, %s2912_s29  ;;  %v2401_v25 = vld [vmem:[%s2902_s1 + $0x30] sm:$0xff]   ;;  %v2405_v29 = vld [vmem:[%s2902_s1 + $0x38] sm:$0xff]   ;;  %v2414_v48 = vld [vmem:[%s2902_s1 + $0x100] sm:$0xff]  }
  0x10   : > { %2124 = vmatpush3.bf16.msra.mxu0 %v2385_v9  ;;  %v2402_v26 = vld [vmem:[%s2902_s1 + $0xf0] sm:$0xff]   ;;  %v2406_v30 = vld [vmem:[%s2902_s1 + $0xf8] sm:$0xff]   ;;  %v2415_v53 = vld [vmem:[%s2902_s1 + $0x1c0] sm:$0xff]  }
  0x11   : > { %2125 = vmatprep.subr.bf16.mxu0 %v2388_v12  ;;  %v2403_v27 = vld [vmem:[%s2902_s1 + $0xb0] sm:$0xff]   ;;  %s2662_s17 = scalar_lea.vmem %s2901_s0, %s2351_s7  ;;  %v2410_v38 = vld [vmem:[%s2902_s1 + $0xb8] sm:$0xff]   ;;  %v2417_v55 = vld [vmem:[%s2902_s1 + $0x148] sm:$0xff]  }
  0x12   : > { %2164 = vmatpush3.bf16.msra.mxu1 %v2387_v11  ;;  %v283_v31 = vld [vmem:[%s2662_s17 + $0x8] sm:$0xf]  ;;  %v284_v32 = vld [vmem:[%s2662_s17 + $0x10] sm:$0xf]  ;;  %v292_v33 = vld [vmem:[%s2662_s17 + $0xc] sm:$0x1] }
  0x13   : > { %2165 = vmatprep.subr.bf16.mxu1 %v2390_v14  ;;  %v293_v34 = vld [vmem:[%s2662_s17 + $0x14] sm:$0x1]  ;;  %v1936_v35 = vcombine.low %v283_v31, %v292_v33  ;;  %v1954_v36 = vcombine.low %v283_v31, %v284_v32  ;;  %v282_v39 = vld [vmem:[%s2662_s17] sm:$0xf]  ;;  %v291_v40 = vld [vmem:[%s2662_s17 + $0x4] sm:$0x1] }
  0x14   : > { %2126 = vmatpush3.bf16.msra.mxu0 %v2389_v13  ;;  %v1937_v37 = vcombine.low %v284_v32, %v293_v34  ;;  %v1935_v41 = vcombine.low %v282_v39, %v291_v40  ;;  %v1953_v42 = vcombine.low %v282_v39, %v283_v31  ;;  %v2416_v58 = vld [vmem:[%s2902_s1 + $0x180] sm:$0xff]   ;;  %v2418_v60 = vld [vmem:[%s2902_s1 + $0x108] sm:$0xff]   ;;  %v285_v63 = vld [vmem:[%s2662_s17 + $0x18] sm:$0xf] }
  0x15   : > { %2127 = vmatprep.subr.bf16.mxu0 %v2392_v16  ;;  %1284 = vmatprep.mubr.bf16.mxu0 %v1954_v36  ;;  %v390_v44 = vshrl.u32 %v1936_v35, 16  ;;  %v392_v45 = vshll.u32 %v1936_v35, 16  ;;  %v2419_v62 = vld [vmem:[%s2902_s1 + $0x1c8] sm:$0xff]   ;;  %v286_v1 = vld [vmem:[%s2662_s17 + $0x20] sm:$0xf]  ;;  %v1962_v4 = vcombine.low %v284_v32, %v285_v63  ;;  %v2425_v9 = vld [vmem:[%s2902_s1 + $0x150] sm:$0xff]  }
  0x16   : > { %2166 = vmatpush3.bf16.msra.mxu1 %v2391_v15  ;;  %v397_v46 = vshrl.u32 %v1937_v37, 16  ;;  %v399_v47 = vshll.u32 %v1937_v37, 16  ;;  %v385_v49 = vshll.u32 %v1935_v41, 16  ;;  %v383_v50 = vshrl.u32 %v1935_v41, 16  ;;  %v294_v2 = vld [vmem:[%s2662_s17 + $0x1c] sm:$0x1] }
  0x17   : > { %2167 = vmatprep.subr.bf16.mxu1 %v2394_v18  ;;  %v394_v51 = vrot.slane %v392_v45, 1  ;;  %v295_v3 = vld [vmem:[%s2662_s17 + $0x24] sm:$0x1]  ;;  %v1938_v5 = vcombine.low %v285_v63, %v294_v2  ;;  %v1963_v7 = vcombine.low %v285_v63, %v286_v1  ;;  %v2423_v8 = vld [vmem:[%s2902_s1 + $0x188] sm:$0xff]   ;;  %v2426_v14 = vld [vmem:[%s2902_s1 + $0x110] sm:$0xff]  }
  0x18   : > { %2128 = vmatpush3.bf16.msra.mxu0 %v2393_v17  ;;  %v401_v52 = vrot.slane %v399_v47, 1  ;;  %v387_v54 = vrot.slane %v385_v49, 1  ;;  %v1939_v6 = vcombine.low %v286_v1, %v295_v3  ;;  %v2427_v17 = vld [vmem:[%s2902_s1 + $0x1d0] sm:$0xff]   ;;  %v2435_v34 = vld [vmem:[%s2902_s1 + $0x198] sm:$0xff]   ;;  %v2437_v35 = vld [vmem:[%s2902_s1 + $0x160] sm:$0xff]  }
  0x19   : > { %2129 = vmatprep.subr.bf16.mxu0 %v2396_v20  ;;  %v395_v56 = vor.u32 %v394_v51, %v390_v44  ;;  %v404_v10 = vshrl.u32 %v1938_v5, 16  ;;  %v406_v11 = vshll.u32 %v1938_v5, 16  ;;  %v2428_v18 = vld [vmem:[%s2902_s1 + $0x190] sm:$0xff]   ;;  %v2438_v40 = vld [vmem:[%s2902_s1 + $0x120] sm:$0xff]   ;;  %v2441_v47 = vld [vmem:[%s2902_s1 + $0x168] sm:$0xff]  }
  0x1a   : > { %2168 = vmatpush3.bf16.msra.mxu1 %v2395_v19  ;;  %v402_v57 = vor.u32 %v401_v52, %v397_v46  ;;  %v388_v59 = vor.u32 %v387_v54, %v383_v50  ;;  %v411_v12 = vshrl.u32 %v1939_v6, 16  ;;  %v413_v13 = vshll.u32 %v1939_v6, 16  ;;  %v2440_v44 = vld [vmem:[%s2902_s1 + $0x1a0] sm:$0xff]   ;;  %v2443_v51 = vld [vmem:[%s2902_s1 + $0x1e8] sm:$0xff]   ;;  %v289_v52 = vld [vmem:[%s2662_s17 + $0x38] sm:$0xf] }
  0x1b   : > { %2169 = vmatprep.subr.bf16.mxu1 %v2398_v22  ;;  %v408_v15 = vrot.slane %v406_v11, 1  ;;  %v2430_v22 = vld [vmem:[%s2902_s1 + $0x118] sm:$0xff]   ;;  %v2450_v2 = vld [vmem:[%s2902_s1 + $0x130] sm:$0xff]  }
  0x1c   : > { %2130 = vmatpush3.bf16.msra.mxu0 %v2397_v21  ;;  %v1956_v61 = vcombine.low %v395_v56, %v402_v57  ;;  %v1955_v0 = vcombine.low %v388_v59, %v395_v56  ;;  %v415_v16 = vrot.slane %v413_v13, 1  ;;  %v2429_v21 = vld [vmem:[%s2902_s1 + $0x158] sm:$0xff]   ;;  %v2451_v5 = vld [vmem:[%s2902_s1 + $0x1f0] sm:$0xff]  }
  0x1d   : > { %2131 = vmatprep.subr.bf16.mxu0 %v2400_v24  ;;  %v409_v19 = vor.u32 %v408_v15, %v404_v10  ;;  %v298_v54 = vld [vmem:[%s2662_s17 + $0x3c] sm:$0x1]  ;;  %v2452_v6 = vld [vmem:[%s2902_s1 + $0x1b0] sm:$0xff]  }
  0x1e   : > { %2170 = vmatpush3.bf16.msra.mxu1 %v2399_v23  ;;  %1349 = vmatprep.mubr.bf16.mxu1 %v1956_v61  ;;  %v416_v20 = vor.u32 %v415_v16, %v411_v12  ;;  %v2449_v61 = vld [vmem:[%s2902_s1 + $0x170] sm:$0xff]   ;;  %v2454_v10 = vld [vmem:[%s2902_s1 + $0x138] sm:$0xff]  }
  0x1f   : > { %2171 = vmatprep.subr.bf16.mxu1 %v2402_v26  ;;  %v1964_v24 = vcombine.low %v402_v57, %v409_v19  ;;  %v287_v26 = vld [vmem:[%s2662_s17 + $0x28] sm:$0xf]  ;;  %v1942_v57 = vcombine.low %v289_v52, %v298_v54  ;;  %v2455_v13 = vld [vmem:[%s2902_s1 + $0x1f8] sm:$0xff]   ;;  %v1903_v15 = vld [vmem:[%s2662_s17 + $0x50] sm:$0xf] }
  0x20   : > { %2132 = vmatpush3.bf16.msra.mxu0 %v2401_v25  ;;  %v1965_v23 = vcombine.low %v409_v19, %v416_v20  ;;  %v2431_v25 = vld [vmem:[%s2902_s1 + $0x1d8] sm:$0xff]  }
  0x21   : > { %2133 = vmatprep.subr.bf16.mxu0 %v2404_v28  ;;  %v296_v28 = vld [vmem:[%s2662_s17 + $0x2c] sm:$0x1]  ;;  %v432_v63 = vshrl.u32 %v1942_v57, 16  ;;  %v1904_v16 = vld [vmem:[%s2662_s17 + $0x58] sm:$0xf] }
  0x22   : > { %2172 = vmatpush3.bf16.msra.mxu1 %v2403_v27  ;;  %v288_v27 = vld [vmem:[%s2662_s17 + $0x30] sm:$0xf]  ;;  %v1940_v31 = vcombine.low %v287_v26, %v296_v28  ;;  %v2458_v19 = vld [vmem:[%s2902_s1 + $0x1b8] sm:$0xff]   ;;  %v2464_v28 = vld [vmem:[%s2902_s1 + $0x208] sm:$0xff]  }
  0x23   : > { %2173 = vmatprep.subr.bf16.mxu1 %v2406_v30  ;;  %v1971_v30 = vcombine.low %v286_v1, %v287_v26  ;;  %v1972_v33 = vcombine.low %v287_v26, %v288_v27  ;;  %v1980_v56 = vcombine.low %v288_v27, %v289_v52 }
  0x24   : > { %2134 = vmatpush3.bf16.msra.mxu0 %v2405_v29  ;;  %v297_v29 = vld [vmem:[%s2662_s17 + $0x34] sm:$0x1]  ;;  %v418_v36 = vshrl.u32 %v1940_v31, 16  ;;  %v420_v37 = vshll.u32 %v1940_v31, 16 }
  0x25   : > { %2199 = vmatprep.subr.bf16.mxu0 %v2413_v43  ;;  %v1941_v32 = vcombine.low %v288_v27, %v297_v29  ;;  %v2439_v43 = vld [vmem:[%s2902_s1 + $0x1e0] sm:$0xff]  }
  0x26   : > { %2174 = vmatpush3.bf16.msra.mxu1 %v2410_v38  ;;  %v422_v41 = vrot.slane %v420_v37, 1  ;;  %v2463_v27 = vld [vmem:[%s2904_s3] sm:$0xff]  }
  0x27   : > { %1285 = vmatmul.mubr.bf16.vlgmr.msra.gmra.mrb[0].mxu0 %v1953_v42  ;;  %2239 = vmatprep.subr.bf16.mxu1 %v2415_v53  ;;  %v425_v38 = vshrl.u32 %v1941_v32, 16  ;;  %v427_v39 = vshll.u32 %v1941_v32, 16  ;;  %v290_v53 = vld [vmem:[%s2662_s17 + $0x40] sm:$0xf] }
  0x28   : > { %2200 = vmatpush3.bf16.msra.mxu0 %v2414_v48  ;;  %1292 = vmatprep.mubr.bf16.mxu0 %v1963_v7  ;;  %v423_v45 = vor.u32 %v422_v41, %v418_v36  ;;  %v2442_v48 = vld [vmem:[%s2902_s1 + $0x128] sm:$0xff]   ;;  %v1981_v59 = vcombine.low %v289_v52, %v290_v53 }
  0x29   : > { %2201 = vmatprep.subr.bf16.mxu0 %v2417_v55  ;;  %1350 = vmatmul.mubr.bf16.vlgmr.msra.gmra.mrb[0].mxu1 %v1955_v0  ;;  %v429_v42 = vrot.slane %v427_v39, 1  ;;  %v299_v55 = vld [vmem:[%s2662_s17 + $0x44] sm:$0x1]  ;;  %v434_v0 = vshll.u32 %v1942_v57, 16  ;;  %v1906_v36 = vld [vmem:[%s2662_s17 + $0x68] sm:$0xf] }
  0x2a   : > { %2240 = vmatpush3.bf16.msra.mxu1 %v2416_v58  ;;  %1357 = vmatprep.mubr.bf16.mxu1 %v1965_v23  ;;  %v1973_v50 = vcombine.low %v416_v20, %v423_v45  ;;  %v1943_v58 = vcombine.low %v290_v53, %v299_v55  ;;  %v2459_v20 = vld [vmem:[%s2902_s1 + $0x200] sm:$0xff]   ;;  %v1919_v23 = vld [vmem:[%s2662_s17 + $0x94] sm:$0x1] }
  0x2b   : > { %2241 = vmatprep.subr.bf16.mxu1 %v2419_v62  ;;  %v430_v46 = vor.u32 %v429_v42, %v425_v38  ;;  %v436_v3 = vrot.slane %v434_v0, 1  ;;  %v2468_v39 = vld [vmem:[%s2902_s1 + $0x210] sm:$0xff]  }
  0x2c   : > { %2202 = vmatpush3.bf16.msra.mxu0 %v2418_v60  ;;  %v2447_v60 = vld [vmem:[%s2902_s1 + $0x1a8] sm:$0xff]   ;;  %v446_v62 = vshll.u32 %v1943_v58, 16  ;;  %v444_v1 = vshrl.u32 %v1943_v58, 16  ;;  %v2830_v0 = vld [vmem:[%s2662_s17 + $0xb0] sm:$0xf] }
  0x2d   : > { %2203 = vmatprep.subr.bf16.mxu0 %v2425_v9  ;;  %v1974_v49 = vcombine.low %v423_v45, %v430_v46  ;;  %v437_v7 = vor.u32 %v436_v3, %v432_v63  ;;  %v2453_v9 = vld [vmem:[%s2902_s1 + $0x178] sm:$0xff]   ;;  %v1922_v45 = vld [vmem:[%s2662_s17 + $0xac] sm:$0x1]  ;;  %v2477_v63 = vld [vmem:[%s2902_s1 + $0x220] sm:$0xff]  }
  0x2e   : > { %2242 = vmatpush3.bf16.msra.mxu1 %v2423_v8  ;;  %v1916_v3 = vld [vmem:[%s2662_s17 + $0xb8] sm:$0xf] }
  0x2f   : > { %1293 = vmatmul.mubr.bf16.gmra.mrb[4].mxu0 %v1962_v4  ;;  %2243 = vmatprep.subr.bf16.mxu1 %v2427_v17  ;;  %v448_v4 = vrot.slane %v446_v62, 1  ;;  %v1982_v12 = vcombine.low %v430_v46, %v437_v7 }
  0x30   : > { %2204 = vmatpush3.bf16.msra.mxu0 %v2426_v14  ;;  %1300 = vmatprep.mubr.bf16.mxu0 %v1972_v33  ;;  %v1902_v14 = vld [vmem:[%s2662_s17 + $0x48] sm:$0xf]  ;;  %v1905_v33 = vld [vmem:[%s2662_s17 + $0x60] sm:$0xf] }
  0x31   : > { %2205 = vmatprep.subr.bf16.mxu0 %v2429_v21  ;;  %1358 = vmatmul.mubr.bf16.gmra.mrb[4].mxu1 %v1964_v24  ;;  %v449_v8 = vor.u32 %v448_v4, %v444_v1  ;;  %v1957_v17 = vcombine.low %v1902_v14, %v1903_v15  ;;  %v1911_v21 = vld [vmem:[%s2662_s17 + $0x90] sm:$0xf]  ;;  %v1920_v24 = vld [vmem:[%s2662_s17 + $0x9c] sm:$0x1]  ;;  %v1966_v37 = vcombine.low %v1904_v16, %v1905_v33  ;;  %v1923_v4 = vld [vmem:[%s2662_s17 + $0xb4] sm:$0x1] }
  0x32   : > { %2244 = vmatpush3.bf16.msra.mxu1 %v2428_v18  ;;  %1365 = vmatprep.mubr.bf16.mxu1 %v1974_v49  ;;  %v1958_v18 = vcombine.low %v1903_v15, %v1904_v16  ;;  %v1967_v38 = vcombine.low %v1905_v33, %v1906_v36  ;;  %v2474_v15 = vld [vmem:[%s2904_s3 + $0x18] sm:$0xff]   ;;  %v1909_v16 = vld [vmem:[%s2662_s17 + $0x80] sm:$0xf]  ;;  %v1977_v33 = vcombine.low %v2830_v0, %v1916_v3 }
  0x33   : > { %2245 = vmatprep.subr.bf16.mxu1 %v2431_v25  ;;  %v1983_v11 = vcombine.low %v437_v7, %v449_v8  ;;  %v1944_v25 = vcombine.low %v1911_v21, %v1919_v23 }
  0x34   : > { %2206 = vmatpush3.bf16.msra.mxu0 %v2430_v22  ;;  %v1912_v22 = vld [vmem:[%s2662_s17 + $0x98] sm:$0xf] }
  0x35   : > { %2207 = vmatprep.subr.bf16.mxu0 %v2437_v35  ;;  %v1945_v26 = vcombine.low %v1912_v22, %v1920_v24  ;;  %v491_v29 = vshrl.u32 %v1944_v25, 16  ;;  %v1959_v46 = vcombine.low %v1911_v21, %v1912_v22  ;;  %v2486_v21 = vld [vmem:[%s2902_s1 + $0x230] sm:$0xff]   ;;  %v1917_v22 = vld [vmem:[%s2662_s17 + $0xc0] sm:$0xf] }
  0x36   : > { %2246 = vmatpush3.bf16.msra.mxu1 %v2435_v34 }
  0x37   : > { %1301 = vmatmul.mubr.bf16.gmra.mrb[8].mxu0 %v1971_v30  ;;  %2247 = vmatprep.subr.bf16.mxu1 %v2439_v43  ;;  %v493_v30 = vshll.u32 %v1944_v25, 16  ;;  %v498_v31 = vshrl.u32 %v1945_v26, 16  ;;  %v500_v32 = vshll.u32 %v1945_v26, 16  ;;  %v1914_v43 = vld [vmem:[%s2662_s17 + $0xa8] sm:$0xf] }
  0x38   : > { %2208 = vmatpush3.bf16.msra.mxu0 %v2438_v40  ;;  %1308 = vmatprep.mubr.bf16.mxu0 %v1981_v59  ;;  %v1913_v40 = vld [vmem:[%s2662_s17 + $0xa0] sm:$0xf]  ;;  %v1947_v49 = vcombine.low %v1914_v43, %v1922_v45  ;;  %v2472_v59 = vld [vmem:[%s2904_s3 + $0x10] sm:$0xff]   ;;  %v1918_v25 = vld [vmem:[%s2662_s17 + $0xc8] sm:$0xf] }
  0x39   : > { %2209 = vmatprep.subr.bf16.mxu0 %v2441_v47  ;;  %1366 = vmatmul.mubr.bf16.gmra.mrb[8].mxu1 %v1973_v50  ;;  %v495_v34 = vrot.slane %v493_v30, 1  ;;  %v502_v35 = vrot.slane %v500_v32, 1  ;;  %v2465_v47 = vld [vmem:[%s2904_s3 + $0x8] sm:$0xff]   ;;  %v1925_v26 = vld [vmem:[%s2662_s17 + $0xc4] sm:$0x1] }
  0x3a   : > { %2248 = vmatpush3.bf16.msra.mxu1 %v2440_v44  ;;  %1373 = vmatprep.mubr.bf16.mxu1 %v1983_v11  ;;  %v1921_v44 = vld [vmem:[%s2662_s17 + $0xa4] sm:$0x1]  ;;  %v512_v54 = vshrl.u32 %v1947_v49, 16  ;;  %v514_v55 = vshll.u32 %v1947_v49, 16  ;;  %v1950_v30 = vcombine.low %v1917_v22, %v1925_v26  ;;  %v1986_v49 = vcombine.low %v1917_v22, %v1918_v25 }
  0x3b   : > { %2249 = vmatprep.subr.bf16.mxu1 %v2443_v51  ;;  %v496_v41 = vor.u32 %v495_v34, %v491_v29  ;;  %v503_v42 = vor.u32 %v502_v35, %v498_v31  ;;  %v2473_v51 = vld [vmem:[%s2902_s1 + $0x218] sm:$0xff]  }
  0x3c   : > { %2210 = vmatpush3.bf16.msra.mxu0 %v2442_v48  ;;  %v1946_v48 = vcombine.low %v1913_v40, %v1921_v44  ;;  %v516_v58 = vrot.slane %v514_v55, 1  ;;  %v2491_v34 = vld [vmem:[%s2902_s1 + $0x238] sm:$0xff]   ;;  %v533_v35 = vshrl.u32 %v1950_v30, 16 }
  0x3d   : > { %2211 = vmatprep.subr.bf16.mxu0 %v2449_v61  ;;  %v1960_v50 = vcombine.low %v496_v41, %v503_v42  ;;  %v2493_v42 = vld [vmem:[%s2662_s17 + $0xd8] ss:$8 sps:$4 sm:$0xff]  }
  0x3e   : > { %2250 = vmatpush3.bf16.msra.mxu1 %v2447_v60  ;;  %v505_v52 = vshrl.u32 %v1946_v48, 16  ;;  %v507_v53 = vshll.u32 %v1946_v48, 16  ;;  %v2823_v60 = vld [vmem:[%s2662_s17 + $0x78] sm:$0xf] }
  0x3f   : > { %1309 = vmatmul.mubr.bf16.gmra.mrb[12].mxu0 %v1980_v56  ;;  %2251 = vmatprep.subr.bf16.mxu1 %v2451_v5  ;;  %v1907_v56 = vld [vmem:[%s2662_s17 + $0x70] sm:$0xf]  ;;  %v1924_v5 = vld [vmem:[%s2662_s17 + $0xbc] sm:$0x1]  ;;  %v1984_v29 = vcombine.low %v2823_v60, %v1909_v16  ;;  %v2495_v48 = vld [vmem:[%s2662_s17 + $0xf8] ss:$8 sps:$4 sm:$0xff]  }
  0x40   : > { %2212 = vmatpush3.bf16.msra.mxu0 %v2450_v2  ;;  %1414 = vmatprep.mubr.bf16.mxu0 %v1958_v18  ;;  %v509_v57 = vrot.slane %v507_v53, 1  ;;  %v1976_v61 = vcombine.low %v1907_v56, %v2823_v60  ;;  %v1975_v62 = vcombine.low %v1906_v36, %v1907_v56  ;;  %v517_v2 = vor.u32 %v516_v58, %v512_v54  ;;  %v1952_v58 = vld [vmem:[%s2903_s2] ss:$0 sm:$0xff] }
  0x41   : > { %2213 = vmatprep.subr.bf16.mxu0 %v2453_v9  ;;  %1374 = vmatmul.mubr.bf16.gmra.mrb[12].mxu1 %v1982_v12  ;;  %v1949_v7 = vcombine.low %v1916_v3, %v1924_v5  ;;  %v1968_v9 = vcombine.low %v1913_v40, %v1914_v43  ;;  %v535_v36 = vshll.u32 %v1950_v30, 16 }
  0x42   : > { %2252 = vmatpush3.bf16.msra.mxu1 %v2452_v6  ;;  %1479 = vmatprep.mubr.bf16.mxu1 %v1960_v50  ;;  %v510_v1 = vor.u32 %v509_v57, %v505_v52  ;;  %v1948_v6 = vcombine.low %v2830_v0, %v1923_v4  ;;  %v2492_v50 = vld [vmem:[%s2904_s3 + $0x38] sm:$0xff]  }
  0x43   : > { %2253 = vmatprep.subr.bf16.mxu1 %v2455_v13  ;;  %v526_v13 = vshrl.u32 %v1949_v7, 16  ;;  %v528_v14 = vshll.u32 %v1949_v7, 16  ;;  %v537_v40 = vrot.slane %v535_v36, 1 }
  0x44   : > { %2214 = vmatpush3.bf16.msra.mxu0 %v2454_v10  ;;  %v1969_v8 = vcombine.low %v510_v1, %v517_v2  ;;  %v2482_v10 = vld [vmem:[%s2902_s1 + $0x228] sm:$0xff]   ;;  %v519_v11 = vshrl.u32 %v1948_v6, 16  ;;  %v521_v12 = vshll.u32 %v1948_v6, 16 }
  0x45   : > { %2303 = vmatprep.subr.bf16.mxu0 %v2459_v20  ;;  %v530_v18 = vrot.slane %v528_v14, 1  ;;  %v538_v43 = vor.u32 %v537_v40, %v533_v35 }
  0x46   : > { %2254 = vmatpush3.bf16.msra.mxu1 %v2458_v19  ;;  %v1910_v19 = vld [vmem:[%s2662_s17 + $0x88] sm:$0xf] }
  0x47   : > { %1415 = vmatmul.mubr.bf16.vlgmr.msra.gmra.mrb[16].mxu0 %v1957_v17  ;;  %2327 = vmatprep.subr.bf16.mxu1 %v2463_v27  ;;  %v523_v17 = vrot.slane %v521_v12, 1  ;;  %v531_v24 = vor.u32 %v530_v18, %v526_v13 }
  0x48   : > { %2304 = vmatpush3.bf16.msra.mxu0 %v2459_v20  ;;  %1422 = vmatprep.mubr.bf16.mxu0 %v1967_v38  ;;  %v1985_v20 = vcombine.low %v1909_v16, %v1910_v19 }
  0x49   : > { %2305 = vmatprep.subr.bf16.mxu0 %v2464_v28  ;;  %1480 = vmatmul.mubr.bf16.vlgmr.msra.gmra.mrb[16].mxu1 %v1959_v46  ;;  %v524_v23 = vor.u32 %v523_v17, %v519_v11  ;;  %v2490_v46 = vld [vmem:[%s2904_s3 + $0x30] sm:$0xff]  }
  0x4a   : > { %2328 = vmatpush3.bf16.msra.mxu1 %v2463_v27  ;;  %1487 = vmatprep.mubr.bf16.mxu1 %v1969_v8  ;;  %v1926_v27 = vld [vmem:[%s2662_s17 + $0xcc] sm:$0x1] }
  0x4b   : > { %2329 = vmatprep.subr.bf16.mxu1 %v2465_v47  ;;  %v1951_v31 = vcombine.low %v1918_v25, %v1926_v27  ;;  %v1978_v32 = vcombine.low %v524_v23, %v531_v24 }
  0x4c   : > { %2306 = vmatpush3.bf16.msra.mxu0 %v2464_v28  ;;  %v2481_v28 = vld [vmem:[%s2904_s3 + $0x20] sm:$0xff]  }
  0x4d   : > { %2307 = vmatprep.subr.bf16.mxu0 %v2468_v39  ;;  %v542_v38 = vshll.u32 %v1951_v31, 16 }
  0x4e   : > { %2330 = vmatpush3.bf16.msra.mxu1 %v2465_v47  ;;  %v2494_v47 = vld [vmem:[%s2662_s17 + $0xe8] ss:$8 sps:$4 sm:$0xff]  }
  0x4f   : > { %1423 = vmatmul.mubr.bf16.gmra.mrb[20].mxu0 %v1966_v37  ;;  %2331 = vmatprep.subr.bf16.mxu1 %v2472_v59  ;;  %v540_v37 = vshrl.u32 %v1951_v31, 16  ;;  %v544_v41 = vrot.slane %v542_v38, 1 }
  0x50   : > { %2308 = vmatpush3.bf16.msra.mxu0 %v2468_v39  ;;  %1430 = vmatprep.mubr.bf16.mxu0 %v1976_v61  ;;  %v2483_v39 = vld [vmem:[%s2904_s3 + $0x28] sm:$0xff]  }
  0x51   : > { %2309 = vmatprep.subr.bf16.mxu0 %v2473_v51  ;;  %1488 = vmatmul.mubr.bf16.gmra.mrb[20].mxu1 %v1968_v9  ;;  %v545_v44 = vor.u32 %v544_v41, %v540_v37 }
  0x52   : > { %2332 = vmatpush3.bf16.msra.mxu1 %v2472_v59  ;;  %1495 = vmatprep.mubr.bf16.mxu1 %v1978_v32 }
  0x53   : > { %2333 = vmatprep.subr.bf16.mxu1 %v2474_v15  ;;  %v1987_v45 = vcombine.low %v538_v43, %v545_v44 }
  0x54   : > { %2310 = vmatpush3.bf16.msra.mxu0 %v2473_v51  ;;  %v2496_v51 = vld [vmem:[%s2662_s17 + $0x108] ss:$8 sps:$4 sm:$0xff]   ;;  %s2071_s17 = sshll.u32 %s2914_s18, 5 }
  0x55   : > { %2311 = vmatprep.subr.bf16.mxu0 %v2477_v63  ;;  %s2883_s28 = scalar_lea.vmem %s2905_s4, %s2071_s17  ;;  %s275_s6 = scalar_lea.vmem %s2906_s5, %s2071_s17 }
  0x56   : > { %2334 = vmatpush3.bf16.msra.mxu1 %v2474_v15 }
  0x57   : > { %1431 = vmatmul.mubr.bf16.gmra.mrb[24].mxu0 %v1975_v62  ;;  %2335 = vmatprep.subr.bf16.mxu1 %v2481_v28 }
  0x58   : > { %2312 = vmatpush3.bf16.msra.mxu0 %v2477_v63  ;;  %1438 = vmatprep.mubr.bf16.mxu0 %v1985_v20 }
  0x59   : > { %2313 = vmatprep.subr.bf16.mxu0 %v2482_v10  ;;  %1496 = vmatmul.mubr.bf16.gmra.mrb[24].mxu1 %v1977_v33 }
  0x5a   : > { %2336 = vmatpush3.bf16.msra.mxu1 %v2481_v28  ;;  %1503 = vmatprep.mubr.bf16.mxu1 %v1987_v45 }
  0x5b   : > { %2337 = vmatprep.subr.bf16.mxu1 %v2483_v39 }
  0x5c   : > { %2314 = vmatpush3.bf16.msra.mxu0 %v2482_v10 }
  0x5d   : > { %2315 = vmatprep.subr.bf16.mxu0 %v2486_v21 }
  0x5e   : > { %2338 = vmatpush3.bf16.msra.mxu1 %v2483_v39 }
  0x5f   : > { %1439 = vmatmul.mubr.bf16.gmra.mrb[28].mxu0 %v1984_v29  ;;  %2339 = vmatprep.subr.bf16.mxu1 %v2490_v46 }
  0x60   : > { %2316 = vmatpush3.bf16.msra.mxu0 %v2486_v21  ;;  %2319 = vmatprep.mubr.bf16.mxu0 %v2493_v42 }
  0x61   : > { %2317 = vmatprep.subr.bf16.mxu0 %v2491_v34  ;;  %1504 = vmatmul.mubr.bf16.gmra.mrb[28].mxu1 %v1986_v49 }
  0x62   : > { %2340 = vmatpush3.bf16.msra.mxu1 %v2490_v46  ;;  %2343 = vmatprep.mubr.bf16.mxu1 %v2493_v42 }
  0x63   : > { %2341 = vmatprep.subr.bf16.mxu1 %v2492_v50 }
  0x64   : > { %2318 = vmatpush3.bf16.msra.mxu0 %v2491_v34 }
  0x66   : > { %2342 = vmatpush3.bf16.msra.mxu1 %v2492_v50 }
  0x67   : > { %2320 = vmatmul.mubr.bf16.vlgmr.msra.gmra.mrb[32].mxu0 %v2494_v47 }
  0x68   : > { %2323 = vmatprep.mubr.bf16.mxu0 %v2495_v48 }
  0x69   : > { %2344 = vmatmul.mubr.bf16.vlgmr.msra.gmra.mrb[32].mxu1 %v2494_v47 }
  0x6a   : > { %2347 = vmatprep.mubr.bf16.mxu1 %v2495_v48 }
  0x6f   : > { %2324 = vmatmul.mubr.bf16.gmra.mrb[36].mxu0 %v2496_v51 }
  0x71   : > { %2348 = vmatmul.mubr.bf16.gmra.mrb[36].mxu1 %v2496_v51 }
  0xfa   : > { %v2135_v52 = vpop.f32.mrb[0].mxu0 }
  0xfb   : > { %v2136_v53 = vpop.f32.mrb[1].mxu0 }
  0xfc   : > { %v2137_v54 = vadd.f32 %v2136_v53, %v2135_v52  ;;  %v2138_v55 = vpop.f32.mrb[2].mxu0  ;;  %v2175_v60 = vpop.f32.mrb[0].mxu1 }
  0xfd   : > { %v2139_v56 = vpop.f32.mrb[3].mxu0  ;;  %v2176_v61 = vpop.f32.mrb[1].mxu1 }
  0xfe   : > { %v2140_v57 = vadd.f32 %v2139_v56, %v2138_v55  ;;  %v1287_v59 = vadd.f32 %v2137_v54, %v1952_v58  ;;  %v2177_v63 = vadd.f32 %v2176_v61, %v2175_v60  ;;  %v2178_v0 = vpop.f32.mrb[2].mxu1 }
  0xff   : > { %v2179_v2 = vpop.f32.mrb[3].mxu1 }
 0x100   : > { %v1290_v62 = vadd.f32 %v2140_v57, %v1952_v58  ;;  %v1352_v4 = vadd.f32 %v2177_v63, %v1287_v59  ;;  %v2180_v5 = vadd.f32 %v2179_v2, %v2178_v0 }
 0x102   : > { %v2141_v1 = vpop.f32.mrb[4].mxu0  ;;  %v1355_v9 = vadd.f32 %v2180_v5, %v1290_v62 }
 0x103   : > { %v2142_v3 = vpop.f32.mrb[5].mxu0 }
 0x104   : > { %v2143_v6 = vadd.f32 %v2142_v3, %v2141_v1  ;;  %v2144_v7 = vpop.f32.mrb[6].mxu0  ;;  %v2181_v12 = vpop.f32.mrb[4].mxu1 }
 0x105   : > { %v2145_v8 = vpop.f32.mrb[7].mxu0  ;;  %v2182_v13 = vpop.f32.mrb[5].mxu1 }
 0x106   : > { %v2146_v10 = vadd.f32 %v2145_v8, %v2144_v7  ;;  %v1295_v11 = vadd.f32 %v2143_v6, %v1952_v58  ;;  %v2183_v15 = vadd.f32 %v2182_v13, %v2181_v12  ;;  %v2184_v16 = vpop.f32.mrb[6].mxu1 }
 0x107   : > { %v2185_v18 = vpop.f32.mrb[7].mxu1 }
 0x108   : > { %v1298_v14 = vadd.f32 %v2146_v10, %v1952_v58  ;;  %v1360_v20 = vadd.f32 %v2183_v15, %v1295_v11  ;;  %v2186_v21 = vadd.f32 %v2185_v18, %v2184_v16 }
 0x10a   : > { %v2147_v17 = vpop.f32.mrb[8].mxu0  ;;  %v1363_v25 = vadd.f32 %v2186_v21, %v1298_v14 }
 0x10b   : > { %v2148_v19 = vpop.f32.mrb[9].mxu0 }
 0x10c   : > { %v2149_v22 = vadd.f32 %v2148_v19, %v2147_v17  ;;  %v2150_v23 = vpop.f32.mrb[10].mxu0  ;;  %v2187_v28 = vpop.f32.mrb[8].mxu1 }
 0x10d   : > { %v2151_v24 = vpop.f32.mrb[11].mxu0  ;;  %v2188_v29 = vpop.f32.mrb[9].mxu1 }
 0x10e   : > { %v2152_v26 = vadd.f32 %v2151_v24, %v2150_v23  ;;  %v1303_v27 = vadd.f32 %v2149_v22, %v1952_v58  ;;  %v2189_v31 = vadd.f32 %v2188_v29, %v2187_v28  ;;  %v2190_v32 = vpop.f32.mrb[10].mxu1 }
 0x10f   : > { %v2191_v34 = vpop.f32.mrb[11].mxu1 }
 0x110   : > { %v1306_v30 = vadd.f32 %v2152_v26, %v1952_v58  ;;  %v1368_v36 = vadd.f32 %v2189_v31, %v1303_v27  ;;  %v2192_v37 = vadd.f32 %v2191_v34, %v2190_v32 }
 0x112   : > { %v2153_v33 = vpop.f32.mrb[12].mxu0  ;;  %v1371_v41 = vadd.f32 %v2192_v37, %v1306_v30 }
 0x113   : > { %v2154_v35 = vpop.f32.mrb[13].mxu0 }
 0x114   : > { %v2155_v38 = vadd.f32 %v2154_v35, %v2153_v33  ;;  %v2156_v39 = vpop.f32.mrb[14].mxu0  ;;  %v2193_v44 = vpop.f32.mrb[12].mxu1 }
 0x115   : > { %v2157_v40 = vpop.f32.mrb[15].mxu0  ;;  %v2194_v45 = vpop.f32.mrb[13].mxu1 }
 0x116   : > { %v2158_v42 = vadd.f32 %v2157_v40, %v2156_v39  ;;  %v1311_v43 = vadd.f32 %v2155_v38, %v1952_v58  ;;  %v2195_v47 = vadd.f32 %v2194_v45, %v2193_v44  ;;  %v2196_v48 = vpop.f32.mrb[14].mxu1 }
 0x117   : > { %v2197_v50 = vpop.f32.mrb[15].mxu1 }
 0x118   : > { %v1314_v46 = vadd.f32 %v2158_v42, %v1952_v58  ;;  %v1376_v52 = vadd.f32 %v2195_v47, %v1311_v43  ;;  %v2198_v53 = vadd.f32 %v2197_v50, %v2196_v48 }
 0x11a   : > { %v2215_v49 = vpop.f32.mrb[16].mxu0  ;;  %v1379_v57 = vadd.f32 %v2198_v53, %v1314_v46 }
 0x11b   : > { %v2216_v51 = vpop.f32.mrb[17].mxu0 }
 0x11c   : > { %v2217_v54 = vadd.f32 %v2216_v51, %v2215_v49  ;;  %v2218_v55 = vpop.f32.mrb[18].mxu0  ;;  %v2255_v2 = vpop.f32.mrb[16].mxu1 }
 0x11d   : > { %v2219_v56 = vpop.f32.mrb[19].mxu0  ;;  %v2256_v3 = vpop.f32.mrb[17].mxu1 }
 0x11e   : > { %v1417_v59 = vadd.f32 %v2217_v54, %v1352_v4  ;;  %v2220_v60 = vadd.f32 %v2219_v56, %v2218_v55  ;;  %v2257_v7 = vadd.f32 %v2256_v3, %v2255_v2  ;;  %v2258_v8 = vpop.f32.mrb[18].mxu1 }
 0x11f   : > { %v2259_v10 = vpop.f32.mrb[19].mxu1 }
 0x120   : > { %v1420_v61 = vadd.f32 %v2220_v60, %v1355_v9  ;;  %v2260_v12 = vadd.f32 %v2259_v10, %v2258_v8  ;;  %v1482_v13 = vadd.f32 %v2257_v7, %v1417_v59 }
 0x122   : > { %v2221_v62 = vpop.f32.mrb[20].mxu0  ;;  %v1485_v4 = vadd.f32 %v2260_v12, %v1420_v61 }
 0x123   : > { %v2222_v63 = vpop.f32.mrb[21].mxu0 }
 0x124   : > { %v2223_v0 = vadd.f32 %v2222_v63, %v2221_v62  ;;  %v2224_v1 = vpop.f32.mrb[22].mxu0  ;;  %v2261_v17 = vpop.f32.mrb[20].mxu1 }
 0x125   : > { %v2225_v58 = vpop.f32.mrb[23].mxu0  ;;  %v2262_v19 = vpop.f32.mrb[21].mxu1 }
 0x126   : > { %v1425_v5 = vadd.f32 %v2223_v0, %v1360_v20  ;;  %v2226_v6 = vadd.f32 %v2225_v58, %v2224_v1  ;;  %v2263_v23 = vadd.f32 %v2262_v19, %v2261_v17  ;;  %v2264_v24 = vpop.f32.mrb[22].mxu1 }
 0x127   : > { %v2265_v20 = vpop.f32.mrb[23].mxu1 }
 0x128   : > { %v1428_v11 = vadd.f32 %v2226_v6, %v1363_v25  ;;  %v2266_v27 = vadd.f32 %v2265_v20, %v2264_v24  ;;  %v1490_v28 = vadd.f32 %v2263_v23, %v1425_v5 }
 0x12a   : > { %v2227_v14 = vpop.f32.mrb[24].mxu0  ;;  %v1493_v29 = vadd.f32 %v2266_v27, %v1428_v11 }
 0x12b   : > { %v2228_v15 = vpop.f32.mrb[25].mxu0 }
 0x12c   : > { %v2229_v16 = vadd.f32 %v2228_v15, %v2227_v14  ;;  %v2230_v9 = vpop.f32.mrb[26].mxu0  ;;  %v2267_v31 = vpop.f32.mrb[24].mxu1 }
 0x12d   : > { %v2231_v18 = vpop.f32.mrb[27].mxu0  ;;  %v2268_v34 = vpop.f32.mrb[25].mxu1 }
 0x12e   : > { %v1433_v21 = vadd.f32 %v2229_v16, %v1368_v36  ;;  %v2232_v22 = vadd.f32 %v2231_v18, %v2230_v9  ;;  %v2269_v37 = vadd.f32 %v2268_v34, %v2267_v31  ;;  %v2270_v38 = vpop.f32.mrb[26].mxu1 }
 0x12f   : > { %v2271_v40 = vpop.f32.mrb[27].mxu1 }
 0x130   : > { %v1436_v26 = vadd.f32 %v2232_v22, %v1371_v41  ;;  %v2272_v42 = vadd.f32 %v2271_v40, %v2270_v38  ;;  %v1498_v43 = vadd.f32 %v2269_v37, %v1433_v21 }
 0x132   : > { %v2233_v25 = vpop.f32.mrb[28].mxu0  ;;  %v1501_v45 = vadd.f32 %v2272_v42, %v1436_v26 }
 0x133   : > { %v2234_v30 = vpop.f32.mrb[29].mxu0 }
 0x134   : > { %v2235_v32 = vadd.f32 %v2234_v30, %v2233_v25  ;;  %v2236_v33 = vpop.f32.mrb[30].mxu0  ;;  %v2273_v48 = vpop.f32.mrb[28].mxu1 }
 0x135   : > { %v2237_v35 = vpop.f32.mrb[31].mxu0  ;;  %v2274_v51 = vpop.f32.mrb[29].mxu1 }
 0x136   : > { %v1441_v36 = vadd.f32 %v2235_v32, %v1376_v52  ;;  %v2238_v39 = vadd.f32 %v2237_v35, %v2236_v33  ;;  %v2275_v52 = vadd.f32 %v2274_v51, %v2273_v48  ;;  %v2276_v55 = vpop.f32.mrb[30].mxu1 }
 0x137   : > { %v2277_v59 = vpop.f32.mrb[31].mxu1 }
 0x138   : > { %v1444_v41 = vadd.f32 %v2238_v39, %v1379_v57  ;;  %v2278_v61 = vadd.f32 %v2277_v59, %v2276_v55  ;;  %v1506_v0 = vadd.f32 %v2275_v52, %v1441_v36 }
 0x13a   : > { %v2321_v44 = vpop.f32.mrb[32].mxu0  ;;  %v1509_v3 = vadd.f32 %v2278_v61, %v1444_v41 }
 0x13b   : > { %v1555_v46 = vadd.f32 %v2321_v44, %v1490_v28  ;;  %v1546_v47 = vpop.f32.mrb[33].mxu0 }
 0x13c   : > { %v1547_v49 = vadd.f32 %v1546_v47, %v1482_v13  ;;  %v2322_v50 = vpop.f32.mrb[34].mxu0  ;;  %v2345_v7 = vpop.f32.mrb[32].mxu1 }
 0x13d   : > { %v1558_v53 = vadd.f32 %v2322_v50, %v1493_v29  ;;  %v1549_v54 = vpop.f32.mrb[35].mxu0  ;;  %v1579_v60 = vmax.f32 %v1555_v46, 0.0  ;;  %v1699_v11 = vpop.f32.mrb[33].mxu1 }
 0x13e   : > { %v1550_v56 = vadd.f32 %v1549_v54, %v1485_v4  ;;  %v1577_v62 = vmax.f32 %v1547_v49, 0.0  ;;  %v2346_v14 = vpop.f32.mrb[34].mxu1 }
 0x13f   : > { %v1580_v57 = vmax.f32 %v1558_v53, 0.0  ;;  %v2101_v4 = vpack.c.bf16 %v2346_v14, %v2345_v7  ;;  %v1702_v16 = vpop.f32.mrb[35].mxu1 }
 0x140   : > { %v1578_v63 = vmax.f32 %v1550_v56, 0.0  ;;  %v2096_v18 = vpack.c.bf16 %v1702_v16, %v1699_v11 }
 0x141   : > { %v2081_v1 = vpack.c.bf16 %v1580_v57, %v1579_v60  ;;  %2116 = vst [vmem:[%s275_s6 + $0x8] sm:$0xff] %v2101_v4  }
 0x142   : > { %v2076_v2 = vpack.c.bf16 %v1578_v63, %v1577_v62  ;;  %v2325_v58 = vpop.f32.mrb[36].mxu0  ;;  %2097 = vst [vmem:[%s275_s6] sm:$0xff] %v2096_v18  }
 0x143   : > { %2113 = vst [vmem:[%s2883_s28 + $0x8] sm:$0xff] %v2081_v1   ;;  %v1571_v5 = vadd.f32 %v2325_v58, %v1506_v0  ;;  %v1562_v6 = vpop.f32.mrb[37].mxu0 }
 0x144   : > { %2077 = vst [vmem:[%s2883_s28] sm:$0xff] %v2076_v2   ;;  %v1563_v8 = vadd.f32 %v1562_v6, %v1498_v43  ;;  %v2326_v10 = vpop.f32.mrb[38].mxu0  ;;  %v2349_v24 = vpop.f32.mrb[36].mxu1 }
 0x145   : > { %v1574_v12 = vadd.f32 %v2326_v10, %v1509_v3  ;;  %v1565_v13 = vpop.f32.mrb[39].mxu0  ;;  %v1583_v9 = vmax.f32 %v1571_v5, 0.0  ;;  %v1715_v20 = vpop.f32.mrb[37].mxu1 }
 0x146   : > { %v1566_v15 = vadd.f32 %v1565_v13, %v1501_v45  ;;  %v1581_v19 = vmax.f32 %v1563_v8, 0.0  ;;  %v2350_v26 = vpop.f32.mrb[38].mxu1 }
 0x147   : > { %v1584_v17 = vmax.f32 %v1574_v12, 0.0  ;;  %v2111_v27 = vpack.c.bf16 %v2350_v26, %v2349_v24  ;;  %v1718_v28 = vpop.f32.mrb[39].mxu1 }
 0x148   : > { %v1582_v21 = vmax.f32 %v1566_v15, 0.0  ;;  %v2106_v25 = vpack.c.bf16 %v1718_v28, %v1715_v20 }
 0x149   : > { %v2091_v22 = vpack.c.bf16 %v1584_v17, %v1583_v9  ;;  %2118 = vst [vmem:[%s275_s6 + $0x18] sm:$0xff] %v2111_v27  }
 0x14a   : > { %v2086_v23 = vpack.c.bf16 %v1582_v21, %v1581_v19  ;;  %2117 = vst [vmem:[%s275_s6 + $0x10] sm:$0xff] %v2106_v25  }
 0x14b   : > { %2115 = vst [vmem:[%s2883_s28 + $0x18] sm:$0xff] %v2091_v22  }
 0x14c   : > { %2114 = vst [vmem:[%s2883_s28 + $0x10] sm:$0xff] %v2086_v23  }
 0x14d PF: > { %s16_s20 = sadd.s32 1, %s2519_s20   ;;  %s2907_s18 = smov %s2515_s19 }
 0x14e   : > { %p13_p6 = scmp.ge.s32.totalorder %s16_s20, 4   ;;  %s2908_s19 = smov %s2910_s21 }
 0x150   :  { %15 = sbr.rel (!%p13_p6) target bundleno = 2 (0x2), region = 82 }

// kernel: basic_block_forward.3
= control target key start
LH: loop header
LB: loop body
LE: loop exit
PB: predicated region body
PF: predicated region fallthrough
CT: control target
= control target key end

     0   :  { %s2146_s15 = smov 0   ;;  %s2148_s16 = smov 0   ;;  %s2528_s0 = inlined_call_operand.vmem [shape: bf16[2,10,10,128], index: 0, kind: input, shape index: {}]   ;;  %s2529_s1 = inlined_call_operand.vmem [shape: bf16[1152,128], index: 1, kind: input, shape index: {}]   ;;  %s2530_s2 = inlined_call_operand.vmem [shape: f32[1,128], index: 2, kind: input, shape index: {}]   ;;  %s2531_s3 = inlined_call_operand.vmem [shape: bf16[2,8,8,128], index: 3, kind: input, shape index: {}]   ;;  %s2532_s4 = inlined_call_operand.vmem [shape: bf16[2,8,8,128], index: 4, kind: output, shape index: {}]  }
   0x1   :  { %s2150_s17 = smov 0  }
   0x2 LB: > { %s26_s18 = sadd.s32 1, %s2115_s16  ;;  %p1587_p0 = scmp.ge.s32.totalorder %s2119_s17, 1  ;;  %s2119_s17 = sphi %s2150_s17, %s14_s17   ;;  %s2115_s16 = sphi %s2148_s16, %s2534_s16   ;;  %s2111_s15 = sphi %s2146_s15, %s2533_s15  }
   0x3   : > { %p28_p1 = scmp.ge.s32.totalorder %s26_s18, 2  ;;  %p193_p2 = scmp.lt.s32.totalorder %s2119_s17, 3 }
   0x5   : > { %s2536_s18 = smov (%p28_p1, %s26_s18), 0  ;;  %p194_p3 = pnand %p1587_p0, %p193_p2 }
   0x6   : > { %v1996_v0 = vld [vmem:[%s2529_s1 + $0x40] sm:$0xff] (!%p194_p3)   ;;  %v2000_v4 = vld [vmem:[%s2529_s1 + $0x48] sm:$0xff] (!%p194_p3)   ;;  %v2004_v8 = vld [vmem:[%s2529_s1 + $0x50] sm:$0xff] (!%p194_p3)   ;;  %p232_p4 = scmp.lt.s32.totalorder (!%p194_p3), %s2111_s15, 1 }
   0x7   : > { %197 = sbr.rel (%p194_p3) target bundleno = 330 (0x14a), region = 36  ;;  %v1997_v1 = vld [vmem:[%s2529_s1 + $0xc0] sm:$0xff] (!%p194_p3)   ;;  %1759 = vmatprep.subr.bf16.mxu0 (!%p194_p3), %v1996_v0  ;;  %v2001_v5 = vld [vmem:[%s2529_s1 + $0xc8] sm:$0xff] (!%p194_p3)   ;;  %v2005_v9 = vld [vmem:[%s2529_s1 + $0xd0] sm:$0xff] (!%p194_p3)  }
   0x8   : > { %v1998_v2 = vld [vmem:[%s2529_s1] sm:$0xff] (!%p194_p3)   ;;  %1799 = vmatprep.subr.bf16.mxu1 (!%p194_p3), %v1997_v1  ;;  %v2002_v6 = vld [vmem:[%s2529_s1 + $0x8] sm:$0xff] (!%p194_p3)   ;;  %v2006_v10 = vld [vmem:[%s2529_s1 + $0x10] sm:$0xff] (!%p194_p3)  }
   0x9   : > { %v1999_v3 = vld [vmem:[%s2529_s1 + $0x80] sm:$0xff] (!%p194_p3)   ;;  %1760 = vmatpush3.bf16.msra.mxu0 (!%p194_p3), %v1998_v2  ;;  %v2003_v7 = vld [vmem:[%s2529_s1 + $0x88] sm:$0xff] (!%p194_p3)   ;;  %v2007_v11 = vld [vmem:[%s2529_s1 + $0x90] sm:$0xff] (!%p194_p3)  }
   0xa   : > { %1800 = vmatpush3.bf16.msra.mxu1 (!%p194_p3), %v1999_v3  ;;  %1761 = vmatprep.subr.bf16.mxu0 (!%p194_p3), %v2000_v4  ;;  %v2008_v12 = vld [vmem:[%s2529_s1 + $0x58] sm:$0xff] (!%p194_p3)   ;;  %v2012_v16 = vld [vmem:[%s2529_s1 + $0x60] sm:$0xff] (!%p194_p3)   ;;  %v2016_v20 = vld [vmem:[%s2529_s1 + $0x68] sm:$0xff] (!%p194_p3)  }
   0xb   : > { %1801 = vmatprep.subr.bf16.mxu1 (!%p194_p3), %v2001_v5  ;;  %v2009_v13 = vld [vmem:[%s2529_s1 + $0xd8] sm:$0xff] (!%p194_p3)   ;;  %v2013_v17 = vld [vmem:[%s2529_s1 + $0xe0] sm:$0xff] (!%p194_p3)   ;;  %v2017_v21 = vld [vmem:[%s2529_s1 + $0xe8] sm:$0xff] (!%p194_p3)  }
   0xc   : > { %v2010_v14 = vld [vmem:[%s2529_s1 + $0x18] sm:$0xff] (!%p194_p3)   ;;  %v2014_v18 = vld [vmem:[%s2529_s1 + $0x20] sm:$0xff] (!%p194_p3)   ;;  %v2018_v22 = vld [vmem:[%s2529_s1 + $0x28] sm:$0xff] (!%p194_p3)  }
   0xd   : > { %1762 = vmatpush3.bf16.msra.mxu0 (!%p194_p3), %v2002_v6  ;;  %v2011_v15 = vld [vmem:[%s2529_s1 + $0x98] sm:$0xff] (!%p194_p3)   ;;  %v2015_v19 = vld [vmem:[%s2529_s1 + $0xa0] sm:$0xff] (!%p194_p3)   ;;  %v2019_v23 = vld [vmem:[%s2529_s1 + $0xa8] sm:$0xff] (!%p194_p3)  }
   0xe   : > { %1802 = vmatpush3.bf16.msra.mxu1 %v2003_v7  ;;  %1763 = vmatprep.subr.bf16.mxu0 %v2004_v8  ;;  %s2538_s15 = smov (!%p232_p4, %s2111_s15), 1  ;;  %v2020_v24 = vld [vmem:[%s2529_s1 + $0x70] sm:$0xff]   ;;  %v2024_v28 = vld [vmem:[%s2529_s1 + $0x78] sm:$0xff]   ;;  %v2036_v51 = vld [vmem:[%s2529_s1 + $0x140] sm:$0xff]  }
   0xf   : > { %1803 = vmatprep.subr.bf16.mxu1 %v2005_v9  ;;  %v2021_v25 = vld [vmem:[%s2529_s1 + $0xf0] sm:$0xff]   ;;  %s1971_s27 = smul.u32 80, %s2538_s15  ;;  %v2025_v29 = vld [vmem:[%s2529_s1 + $0xf8] sm:$0xff]   ;;  %v2037_v52 = vld [vmem:[%s2529_s1 + $0x1c0] sm:$0xff]   ;;  %s1715_s14 = sshll.u32 %s2538_s15, 5 }
  0x10   : > { %v2022_v26 = vld [vmem:[%s2529_s1 + $0x30] sm:$0xff]   ;;  %v2026_v30 = vld [vmem:[%s2529_s1 + $0x38] sm:$0xff]   ;;  %v2038_v58 = vld [vmem:[%s2529_s1 + $0x100] sm:$0xff]   ;;  %s245_s21 = scalar_lea.vmem %s2531_s3, %s1715_s14  ;;  %s255_s24 = scalar_lea.vmem %s2532_s4, %s1715_s14 }
  0x11   : > { %1764 = vmatpush3.bf16.msra.mxu0 %v2006_v10  ;;  %v2023_v27 = vld [vmem:[%s2529_s1 + $0xb0] sm:$0xff]   ;;  %s2264_s12 = scalar_lea.vmem %s2528_s0, %s1971_s27  ;;  %v2027_v31 = vld [vmem:[%s2529_s1 + $0xb8] sm:$0xff]   ;;  %v2039_v61 = vld [vmem:[%s2529_s1 + $0x180] sm:$0xff]  }
  0x12   : > { %1804 = vmatpush3.bf16.msra.mxu1 %v2007_v11  ;;  %1765 = vmatprep.subr.bf16.mxu0 %v2008_v12  ;;  %v263_v32 = vld [vmem:[%s2264_s12 + $0x8] sm:$0xf]  ;;  %v264_v33 = vld [vmem:[%s2264_s12 + $0x10] sm:$0xf]  ;;  %v2275_v34 = vld [vmem:[%s2264_s12 + $0xc] sm:$0x1] }
  0x13   : > { %1805 = vmatprep.subr.bf16.mxu1 %v2009_v13  ;;  %v2278_v35 = vld [vmem:[%s2264_s12 + $0x14] sm:$0x1]  ;;  %v1594_v36 = vcombine.low %v263_v32, %v2275_v34  ;;  %v1615_v37 = vcombine.low %v263_v32, %v264_v33  ;;  %v262_v38 = vld [vmem:[%s2264_s12] sm:$0xf]  ;;  %v2283_v39 = vld [vmem:[%s2264_s12 + $0x4] sm:$0x1] }
  0x14   : > { %v1595_v40 = vcombine.low %v264_v33, %v2278_v35  ;;  %v1593_v41 = vcombine.low %v262_v38, %v2283_v39  ;;  %v1614_v42 = vcombine.low %v262_v38, %v263_v32  ;;  %v265_v43 = vld [vmem:[%s2264_s12 + $0x18] sm:$0xf]  ;;  %v2289_v44 = vld [vmem:[%s2264_s12 + $0x1c] sm:$0x1]  ;;  %v2040_v0 = vld [vmem:[%s2529_s1 + $0x148] sm:$0xff]  }
  0x15   : > { %1766 = vmatpush3.bf16.msra.mxu0 %v2010_v14  ;;  %1141 = vmatprep.mubr.bf16.mxu0 %v1615_v37  ;;  %v340_v45 = vshrl.u32 %v1594_v36, 16  ;;  %v342_v46 = vshll.u32 %v1594_v36, 16  ;;  %v1596_v50 = vcombine.low %v265_v43, %v2289_v44  ;;  %v1616_v63 = vcombine.low %v264_v33, %v265_v43  ;;  %v2041_v3 = vld [vmem:[%s2529_s1 + $0x1c8] sm:$0xff]   ;;  %v266_v7 = vld [vmem:[%s2264_s12 + $0x20] sm:$0xf] }
  0x16   : > { %1806 = vmatpush3.bf16.msra.mxu1 %v2011_v15  ;;  %1767 = vmatprep.subr.bf16.mxu0 %v2012_v16  ;;  %v349_v47 = vshll.u32 %v1595_v40, 16  ;;  %v333_v48 = vshrl.u32 %v1593_v41, 16  ;;  %v335_v49 = vshll.u32 %v1593_v41, 16  ;;  %v347_v53 = vshrl.u32 %v1595_v40, 16  ;;  %v2042_v5 = vld [vmem:[%s2529_s1 + $0x108] sm:$0xff]   ;;  %v2048_v15 = vld [vmem:[%s2529_s1 + $0x150] sm:$0xff]  }
  0x17   : > { %1807 = vmatprep.subr.bf16.mxu1 %v2013_v17  ;;  %v344_v54 = vrot.slane %v342_v46, 1  ;;  %v354_v59 = vshrl.u32 %v1596_v50, 16  ;;  %v356_v62 = vshll.u32 %v1596_v50, 16  ;;  %v2043_v6 = vld [vmem:[%s2529_s1 + $0x188] sm:$0xff]   ;;  %v2323_v8 = vld [vmem:[%s2264_s12 + $0x24] sm:$0x1]  ;;  %v1623_v11 = vcombine.low %v265_v43, %v266_v7 }
  0x18   : > { %v351_v55 = vrot.slane %v349_v47, 1  ;;  %v337_v56 = vrot.slane %v335_v49, 1  ;;  %v1597_v10 = vcombine.low %v266_v7, %v2323_v8  ;;  %v267_v12 = vld [vmem:[%s2264_s12 + $0x28] sm:$0xf]  ;;  %v2330_v13 = vld [vmem:[%s2264_s12 + $0x2c] sm:$0x1] }
  0x19   : > { %1768 = vmatpush3.bf16.msra.mxu0 %v2014_v18  ;;  %v2298_v57 = vor.u32 %v344_v54, %v340_v45  ;;  %v358_v4 = vrot.slane %v356_v62, 1  ;;  %v1598_v16 = vcombine.low %v267_v12, %v2330_v13  ;;  %v2049_v17 = vld [vmem:[%s2529_s1 + $0x1d0] sm:$0xff]   ;;  %v269_v37 = vld [vmem:[%s2264_s12 + $0x38] sm:$0xf]  ;;  %v2370_v38 = vld [vmem:[%s2264_s12 + $0x3c] sm:$0x1] }
  0x1a   : > { %1808 = vmatpush3.bf16.msra.mxu1 %v2015_v19  ;;  %1769 = vmatprep.subr.bf16.mxu0 %v2016_v20  ;;  %v338_v60 = vor.u32 %v337_v56, %v333_v48  ;;  %v2309_v1 = vor.u32 %v351_v55, %v347_v53  ;;  %v361_v18 = vshrl.u32 %v1597_v10, 16  ;;  %v2050_v19 = vld [vmem:[%s2529_s1 + $0x110] sm:$0xff]   ;;  %v363_v20 = vshll.u32 %v1597_v10, 16  ;;  %v2061_v43 = vld [vmem:[%s2529_s1 + $0x1e0] sm:$0xff]   ;;  %v2065_v54 = vld [vmem:[%s2529_s1 + $0x1e8] sm:$0xff]  }
  0x1b   : > { %1809 = vmatprep.subr.bf16.mxu1 %v2017_v21  ;;  %v2325_v9 = vor.u32 %v358_v4, %v354_v59  ;;  %v1624_v21 = vcombine.low %v266_v7, %v267_v12  ;;  %v2366_v33 = vld [vmem:[%s2264_s12 + $0x34] sm:$0x1]  ;;  %v1600_v46 = vcombine.low %v269_v37, %v2370_v38  ;;  %v2062_v48 = vld [vmem:[%s2529_s1 + $0x120] sm:$0xff]   ;;  %v2066_v56 = vld [vmem:[%s2529_s1 + $0x128] sm:$0xff]  }
  0x1c   : > { %v1617_v2 = vcombine.low %v338_v60, %v2298_v57  ;;  %v2063_v50 = vld [vmem:[%s2529_s1 + $0x1a0] sm:$0xff]   ;;  %v2067_v59 = vld [vmem:[%s2529_s1 + $0x1a8] sm:$0xff]   ;;  %v2075_v10 = vld [vmem:[%s2529_s1 + $0x130] sm:$0xff]  }
  0x1d   : > { %1770 = vmatpush3.bf16.msra.mxu0 %v2018_v22  ;;  %v2334_v14 = vcombine.low %v2309_v1, %v2325_v9  ;;  %v2051_v22 = vld [vmem:[%s2529_s1 + $0x190] sm:$0xff]   ;;  %v382_v53 = vshrl.u32 %v1600_v46, 16  ;;  %v270_v60 = vld [vmem:[%s2264_s12 + $0x40] sm:$0xf] }
  0x1e   : > { %1810 = vmatpush3.bf16.msra.mxu1 %v2019_v23  ;;  %1771 = vmatprep.subr.bf16.mxu0 %v2020_v24  ;;  %v368_v23 = vshrl.u32 %v1598_v16, 16  ;;  %v2052_v24 = vld [vmem:[%s2529_s1 + $0x158] sm:$0xff]  }
  0x1f   : > { %1811 = vmatprep.subr.bf16.mxu1 %v2021_v25  ;;  %1206 = vmatprep.mubr.bf16.mxu1 %v1617_v2  ;;  %v365_v25 = vrot.slane %v363_v20, 1  ;;  %v1635_v2 = vcombine.low %v269_v37, %v270_v60  ;;  %v2080_v20 = vld [vmem:[%s2529_s1 + $0x1b8] sm:$0xff]  }
  0x21   : > { %1772 = vmatpush3.bf16.msra.mxu0 %v2022_v26  ;;  %v2053_v26 = vld [vmem:[%s2529_s1 + $0x1d8] sm:$0xff]  }
  0x22   : > { %1812 = vmatpush3.bf16.msra.mxu1 %v2023_v27  ;;  %1773 = vmatprep.subr.bf16.mxu0 %v2024_v28  ;;  %v370_v27 = vshll.u32 %v1598_v16, 16  ;;  %v2054_v28 = vld [vmem:[%s2529_s1 + $0x118] sm:$0xff]   ;;  %v2433_v16 = vld [vmem:[%s2264_s12 + $0x4c] sm:$0x1] }
  0x23   : > { %1813 = vmatprep.subr.bf16.mxu1 %v2025_v29  ;;  %v2055_v29 = vld [vmem:[%s2529_s1 + $0x198] sm:$0xff]  }
  0x24   : > { %v372_v32 = vrot.slane %v370_v27, 1  ;;  %v2084_v27 = vld [vmem:[%s2529_s1 + $0x208] sm:$0xff]  }
  0x25   : > { %1774 = vmatpush3.bf16.msra.mxu0 %v2026_v30  ;;  %v268_v30 = vld [vmem:[%s2264_s12 + $0x30] sm:$0xf] }
  0x26   : > { %1814 = vmatpush3.bf16.msra.mxu1 %v2027_v31  ;;  %1839 = vmatprep.subr.bf16.mxu0 %v2036_v51  ;;  %v2363_v31 = vor.u32 %v365_v25, %v361_v18  ;;  %v1629_v36 = vcombine.low %v267_v12, %v268_v30  ;;  %v1599_v40 = vcombine.low %v268_v30, %v2366_v33  ;;  %v2079_v18 = vld [vmem:[%s2529_s1 + $0x138] sm:$0xff]  }
  0x27   : > { %1879 = vmatprep.subr.bf16.mxu1 %v2037_v52  ;;  %v2373_v41 = vor.u32 %v372_v32, %v368_v23  ;;  %v1630_v47 = vcombine.low %v268_v30, %v269_v37  ;;  %v2064_v52 = vld [vmem:[%s2529_s1 + $0x168] sm:$0xff]  }
  0x28   : > { %1142 = vmatmul.mubr.bf16.vlgmr.msra.gmra.mrb[0].mxu0 %v1614_v42  ;;  %v2060_v42 = vld [vmem:[%s2529_s1 + $0x160] sm:$0xff]   ;;  %v375_v49 = vshrl.u32 %v1599_v40, 16  ;;  %v377_v51 = vshll.u32 %v1599_v40, 16 }
  0x29   : > { %1840 = vmatpush3.bf16.msra.mxu0 %v2038_v58  ;;  %1207 = vmatmul.mubr.bf16.vlgmr.msra.gmra.mrb[0].mxu1 %v1616_v63  ;;  %v2383_v45 = vcombine.low %v2363_v31, %v2373_v41  ;;  %v384_v58 = vshll.u32 %v1600_v46, 16  ;;  %v287_v46 = vld [vmem:[%s2264_s12 + $0x28] sm:$0xe] }
  0x2a   : > { %1841 = vmatprep.subr.bf16.mxu0 %v2040_v0  ;;  %1880 = vmatpush3.bf16.msra.mxu1 %v2039_v61  ;;  %v379_v55 = vrot.slane %v377_v51, 1  ;;  %v282_v0 = vld [vmem:[%s2264_s12] sm:$0xe] }
  0x2b   : > { %1881 = vmatprep.subr.bf16.mxu1 %v2041_v3  ;;  %1149 = vmatprep.mubr.bf16.mxu0 %v1623_v11  ;;  %v386_v62 = vrot.slane %v384_v58, 1  ;;  %v271_v3 = vld [vmem:[%s2264_s12 + $0x48] sm:$0xf]  ;;  %v2076_v11 = vld [vmem:[%s2529_s1 + $0x1b0] sm:$0xff]   ;;  %v1603_v12 = vcombine.low %v282_v0, %v2283_v39  ;;  %v2078_v39 = vld [vmem:[%s2529_s1 + $0x1f8] sm:$0xff]  }
  0x2c   : > { %1214 = vmatprep.mubr.bf16.mxu1 %v2334_v14  ;;  %v2406_v61 = vor.u32 %v379_v55, %v375_v49  ;;  %v1602_v23 = vcombine.low %v271_v3, %v2433_v16 }
  0x2d   : > { %1842 = vmatpush3.bf16.msra.mxu0 %v2042_v5  ;;  %v2413_v4 = vor.u32 %v386_v62, %v382_v53  ;;  %v1636_v5 = vcombine.low %v270_v60, %v271_v3  ;;  %v2092_v3 = vld [vmem:[%s2529_s1 + $0x228] sm:$0xff]  }
  0x2e   : > { %1843 = vmatprep.subr.bf16.mxu0 %v2048_v15  ;;  %1882 = vmatpush3.bf16.msra.mxu1 %v2043_v6  ;;  %v2074_v6 = vld [vmem:[%s2529_s1 + $0x1f0] sm:$0xff]   ;;  %v2430_v15 = vld [vmem:[%s2264_s12 + $0x44] sm:$0x1]  ;;  %v408_v32 = vshll.u32 %v1602_v23, 16  ;;  %v406_v51 = vshrl.u32 %v1602_v23, 16  ;;  %v1631_v0 = vcombine.low %v2373_v41, %v2406_v61 }
  0x2f   : > { %1883 = vmatprep.subr.bf16.mxu1 %v2049_v17  ;;  %v2420_v7 = vcombine.low %v2406_v61, %v2413_v4  ;;  %v2077_v17 = vld [vmem:[%s2529_s1 + $0x178] sm:$0xff]   ;;  %v2095_v61 = vld [vmem:[%s2529_s1 + $0x230] sm:$0xff]  }
  0x30   : > { %1150 = vmatmul.mubr.bf16.gmra.mrb[4].mxu0 %v1616_v63  ;;  %v2073_v63 = vld [vmem:[%s2529_s1 + $0x170] sm:$0xff]   ;;  %v410_v55 = vrot.slane %v408_v32, 1 }
  0x31   : > { %1844 = vmatpush3.bf16.msra.mxu0 %v2050_v19  ;;  %1215 = vmatmul.mubr.bf16.gmra.mrb[4].mxu1 %v1624_v21  ;;  %v1618_v19 = vcombine.low %v2298_v57, %v2309_v1  ;;  %v2083_v57 = vld [vmem:[%s2529_s1 + $0x200] sm:$0xff]  }
  0x32   : > { %1845 = vmatprep.subr.bf16.mxu0 %v2052_v24  ;;  %1884 = vmatpush3.bf16.msra.mxu1 %v2051_v22  ;;  %v1601_v22 = vcombine.low %v270_v60, %v2430_v15  ;;  %v284_v24 = vld [vmem:[%s2264_s12 + $0x10] sm:$0xe]  ;;  %v411_v58 = vor.u32 %v410_v55, %v406_v51 }
  0x33   : > { %1885 = vmatprep.subr.bf16.mxu1 %v2053_v26  ;;  %1157 = vmatprep.mubr.bf16.mxu0 %v1629_v36  ;;  %v1605_v26 = vcombine.low %v284_v24, %v2278_v35 }
  0x34   : > { %1222 = vmatprep.mubr.bf16.mxu1 %v2383_v45  ;;  %v396_v37 = vshll.u32 %v1601_v22, 16 }
  0x35   : > { %1846 = vmatpush3.bf16.msra.mxu0 %v2054_v28  ;;  %v285_v28 = vld [vmem:[%s2264_s12 + $0x18] sm:$0xe]  ;;  %v438_v30 = vrot.slane %v1605_v26, 1 }
  0x36   : > { %1847 = vmatprep.subr.bf16.mxu0 %v2060_v42  ;;  %1886 = vmatpush3.bf16.msra.mxu1 %v2055_v29  ;;  %v286_v29 = vld [vmem:[%s2264_s12 + $0x20] sm:$0xe] }
  0x37   : > { %1887 = vmatprep.subr.bf16.mxu1 %v2061_v43  ;;  %v1607_v35 = vcombine.low %v286_v29, %v2323_v8 }
  0x38   : > { %1158 = vmatmul.mubr.bf16.gmra.mrb[8].mxu0 %v1624_v21  ;;  %v283_v21 = vld [vmem:[%s2264_s12 + $0x8] sm:$0xe] }
  0x39   : > { %1848 = vmatpush3.bf16.msra.mxu0 %v2062_v48  ;;  %1223 = vmatmul.mubr.bf16.gmra.mrb[8].mxu1 %v1630_v47  ;;  %v1604_v25 = vcombine.low %v283_v21, %v2275_v34  ;;  %v1606_v34 = vcombine.low %v285_v28, %v2289_v44  ;;  %v440_v43 = vrot.slane %v1607_v35, 1  ;;  %v2087_v48 = vld [vmem:[%s2529_s1 + $0x210] sm:$0xff]   ;;  %v1608_v44 = vcombine.low %v287_v46, %v2330_v13  ;;  %v1613_v21 = vld [vmem:[%s2530_s2] ss:$0 sm:$0xff] }
  0x3a   : > { %1849 = vmatprep.subr.bf16.mxu0 %v2064_v52  ;;  %1888 = vmatpush3.bf16.msra.mxu1 %v2063_v50  ;;  %v1625_v50 = vcombine.low %v2325_v9, %v2363_v31  ;;  %v2088_v52 = vld [vmem:[%s2529_s1 + $0x218] sm:$0xff]   ;;  %v398_v13 = vrot.slane %v396_v37, 1 }
  0x3b   : > { %1889 = vmatprep.subr.bf16.mxu1 %v2065_v54  ;;  %1165 = vmatprep.mubr.bf16.mxu0 %v1635_v2  ;;  %v437_v1 = vrot.slane %v1604_v25, 1  ;;  %v439_v42 = vrot.slane %v1606_v34, 1  ;;  %v441_v53 = vrot.slane %v1608_v44, 1 }
  0x3c   : > { %1230 = vmatprep.mubr.bf16.mxu1 %v2420_v7 }
  0x3d   : > { %1850 = vmatpush3.bf16.msra.mxu0 %v2066_v56  ;;  %v1621_v40 = vcombine.low %v437_v1, %v438_v30  ;;  %v1627_v49 = vcombine.low %v439_v42, %v440_v43  ;;  %v290_v56 = vld [vmem:[%s2264_s12 + $0x40] sm:$0xe]  ;;  %v1622_v9 = vcombine.low %v438_v30, %v439_v42 }
  0x3e   : > { %1851 = vmatprep.subr.bf16.mxu0 %v2073_v63  ;;  %1890 = vmatpush3.bf16.msra.mxu1 %v2067_v59  ;;  %v1611_v62 = vcombine.low %v290_v56, %v2430_v15  ;;  %v2091_v63 = vld [vmem:[%s2529_s1 + $0x220] sm:$0xff]  }
  0x3f   : > { %1891 = vmatprep.subr.bf16.mxu1 %v2074_v6  ;;  %v1628_v6 = vcombine.low %v440_v43, %v441_v53 }
  0x40   : > { %1166 = vmatmul.mubr.bf16.gmra.mrb[12].mxu0 %v1630_v47  ;;  %v288_v47 = vld [vmem:[%s2264_s12 + $0x30] sm:$0xe] }
  0x41   : > { %1271 = vmatprep.mubr.bf16.mxu0 %v2334_v14  ;;  %1852 = vmatpush3.bf16.msra.mxu0 %v2075_v10  ;;  %v436_v14 = vrot.slane %v1603_v12, 1  ;;  %v1609_v8 = vcombine.low %v288_v47, %v2366_v33  ;;  %v289_v33 = vld [vmem:[%s2264_s12 + $0x38] sm:$0xe]  ;;  %v291_v10 = vld [vmem:[%s2264_s12 + $0x48] sm:$0xe] }
  0x42   : > { %1231 = vmatmul.mubr.bf16.gmra.mrb[12].mxu1 %v1636_v5  ;;  %1853 = vmatprep.subr.bf16.mxu0 %v2077_v17  ;;  %v1610_v60 = vcombine.low %v289_v33, %v2370_v38  ;;  %v447_v5 = vrot.slane %v1611_v62, 1  ;;  %v1612_v12 = vcombine.low %v291_v10, %v2433_v16 }
  0x43   : > { %1892 = vmatpush3.bf16.msra.mxu1 %v2076_v11  ;;  %v1620_v36 = vcombine.low %v436_v14, %v437_v1  ;;  %1336 = vmatprep.mubr.bf16.mxu1 %v1621_v40  ;;  %v442_v54 = vrot.slane %v1609_v8, 1  ;;  %v2096_v11 = vld [vmem:[%s2529_s1 + $0x238] sm:$0xff]  }
  0x44   : > { %1893 = vmatprep.subr.bf16.mxu1 %v2078_v39  ;;  %v443_v38 = vrot.slane %v1610_v60, 1 }
  0x45   : > { %1854 = vmatpush3.bf16.msra.mxu0 %v2079_v18  ;;  %v1633_v59 = vcombine.low %v441_v53, %v442_v54 }
  0x46   : > { %1931 = vmatprep.subr.bf16.mxu0 %v2083_v57  ;;  %v1639_v41 = vcombine.low %v443_v38, %v447_v5  ;;  %v1634_v15 = vcombine.low %v442_v54, %v443_v38 }
  0x47   : > { %1894 = vmatpush3.bf16.msra.mxu1 %v2080_v20 }
  0x48   : > { %1272 = vmatmul.mubr.bf16.vlgmr.msra.gmra.mrb[16].mxu0 %v1618_v19  ;;  %1955 = vmatprep.subr.bf16.mxu1 %v2083_v57 }
  0x49   : > { %1932 = vmatpush3.bf16.msra.mxu0 %v2083_v57  ;;  %1279 = vmatprep.mubr.bf16.mxu0 %v2383_v45  ;;  %v394_v45 = vshrl.u32 %v1601_v22, 16 }
  0x4a   : > { %1933 = vmatprep.subr.bf16.mxu0 %v2084_v27  ;;  %1337 = vmatmul.mubr.bf16.vlgmr.msra.gmra.mrb[16].mxu1 %v1620_v36 }
  0x4b   : > { %1963 = vmatpush3.bf16.msra.mxu1 %v2083_v57  ;;  %1344 = vmatprep.mubr.bf16.mxu1 %v1627_v49  ;;  %v399_v31 = vor.u32 %v398_v13, %v394_v45 }
  0x4c   : > { %1956 = vmatprep.subr.bf16.mxu1 %v2084_v27 }
  0x4d   : > { %1934 = vmatpush3.bf16.msra.mxu0 %v2084_v27  ;;  %v1638_v2 = vcombine.low %v399_v31, %v411_v58 }
  0x4e   : > { %1935 = vmatprep.subr.bf16.mxu0 %v2087_v48 }
  0x4f   : > { %1964 = vmatpush3.bf16.msra.mxu1 %v2084_v27 }
  0x50   : > { %1280 = vmatmul.mubr.bf16.gmra.mrb[20].mxu0 %v1625_v50  ;;  %1957 = vmatprep.subr.bf16.mxu1 %v2087_v48 }
  0x51   : > { %1936 = vmatpush3.bf16.msra.mxu0 %v2087_v48  ;;  %1287 = vmatprep.mubr.bf16.mxu0 %v2420_v7  ;;  %v1637_v7 = vcombine.low %v2413_v4, %v399_v31  ;;  %v451_v4 = vrot.slane %v1612_v12, 1 }
  0x52   : > { %1937 = vmatprep.subr.bf16.mxu0 %v2088_v52  ;;  %1345 = vmatmul.mubr.bf16.gmra.mrb[20].mxu1 %v1622_v9 }
  0x53   : > { %1965 = vmatpush3.bf16.msra.mxu1 %v2087_v48  ;;  %1352 = vmatprep.mubr.bf16.mxu1 %v1633_v59  ;;  %v1640_v17 = vcombine.low %v447_v5, %v451_v4 }
  0x54   : > { %1958 = vmatprep.subr.bf16.mxu1 %v2088_v52 }
  0x55   : > { %1938 = vmatpush3.bf16.msra.mxu0 %v2088_v52 }
  0x56   : > { %1939 = vmatprep.subr.bf16.mxu0 %v2091_v63 }
  0x57   : > { %1966 = vmatpush3.bf16.msra.mxu1 %v2088_v52 }
  0x58   : > { %1288 = vmatmul.mubr.bf16.gmra.mrb[24].mxu0 %v1631_v0  ;;  %1959 = vmatprep.subr.bf16.mxu1 %v2091_v63 }
  0x59   : > { %1940 = vmatpush3.bf16.msra.mxu0 %v2091_v63  ;;  %1295 = vmatprep.mubr.bf16.mxu0 %v1638_v2 }
  0x5a   : > { %1941 = vmatprep.subr.bf16.mxu0 %v2092_v3  ;;  %1353 = vmatmul.mubr.bf16.gmra.mrb[24].mxu1 %v1628_v6 }
  0x5b   : > { %1967 = vmatpush3.bf16.msra.mxu1 %v2091_v63  ;;  %1360 = vmatprep.mubr.bf16.mxu1 %v1639_v41 }
  0x5c   : > { %1960 = vmatprep.subr.bf16.mxu1 %v2092_v3 }
  0x5d   : > { %1942 = vmatpush3.bf16.msra.mxu0 %v2092_v3 }
  0x5e   : > { %1943 = vmatprep.subr.bf16.mxu0 %v2095_v61 }
  0x5f   : > { %1968 = vmatpush3.bf16.msra.mxu1 %v2092_v3 }
  0x60   : > { %1296 = vmatmul.mubr.bf16.gmra.mrb[28].mxu0 %v1637_v7  ;;  %1961 = vmatprep.subr.bf16.mxu1 %v2095_v61 }
  0x61   : > { %1944 = vmatpush3.bf16.msra.mxu0 %v2095_v61  ;;  %1947 = vmatprep.mubr.bf16.mxu0 %v1622_v9 }
  0x62   : > { %1945 = vmatprep.subr.bf16.mxu0 %v2096_v11  ;;  %1361 = vmatmul.mubr.bf16.gmra.mrb[28].mxu1 %v1634_v15 }
  0x63   : > { %1969 = vmatpush3.bf16.msra.mxu1 %v2095_v61  ;;  %1951 = vmatprep.mubr.bf16.mxu1 %v1634_v15 }
  0x64   : > { %1962 = vmatprep.subr.bf16.mxu1 %v2096_v11 }
  0x65   : > { %1946 = vmatpush3.bf16.msra.mxu0 %v2096_v11 }
  0x67   : > { %1970 = vmatpush3.bf16.msra.mxu1 %v2096_v11 }
  0x68   : > { %1948 = vmatmul.mubr.bf16.vlgmr.msra.gmra.mrb[32].mxu0 %v1628_v6 }
  0x6a   : > { %1952 = vmatmul.mubr.bf16.vlgmr.msra.gmra.mrb[32].mxu1 %v1640_v17 }
  0xfb   : > { %v1775_v39 = vpop.f32.mrb[0].mxu0 }
  0xfc   : > { %v1776_v18 = vpop.f32.mrb[1].mxu0  ;;  %v1815_v22 = vpop.f32.mrb[0].mxu1 }
  0xfd   : > { %v1777_v14 = vadd.f32 %v1776_v18, %v1775_v39  ;;  %v1778_v16 = vpop.f32.mrb[2].mxu0  ;;  %v1816_v24 = vpop.f32.mrb[1].mxu1 }
  0xfe   : > { %v1779_v19 = vpop.f32.mrb[3].mxu0  ;;  %v1817_v25 = vadd.f32 %v1816_v24, %v1815_v22  ;;  %v1818_v26 = vpop.f32.mrb[2].mxu1 }
  0xff   : > { %v1780_v20 = vadd.f32 %v1779_v19, %v1778_v16  ;;  %v1144_v23 = vadd.f32 %v1777_v14, %v1613_v21  ;;  %v1819_v1 = vpop.f32.mrb[3].mxu1 }
 0x100   : > { %v1820_v29 = vadd.f32 %v1819_v1, %v1818_v26 }
 0x101   : > { %v1147_v57 = vadd.f32 %v1780_v20, %v1613_v21  ;;  %v1209_v28 = vadd.f32 %v1817_v25, %v1144_v23 }
 0x103   : > { %v1781_v27 = vpop.f32.mrb[4].mxu0  ;;  %v1212_v32 = vadd.f32 %v1820_v29, %v1147_v57 }
 0x104   : > { %v1782_v30 = vpop.f32.mrb[5].mxu0  ;;  %v1821_v40 = vpop.f32.mrb[4].mxu1 }
 0x105   : > { %v1783_v34 = vadd.f32 %v1782_v30, %v1781_v27  ;;  %v1784_v35 = vpop.f32.mrb[6].mxu0  ;;  %v1822_v43 = vpop.f32.mrb[5].mxu1 }
 0x106   : > { %v1785_v36 = vpop.f32.mrb[7].mxu0  ;;  %v1823_v46 = vadd.f32 %v1822_v43, %v1821_v40  ;;  %v1824_v47 = vpop.f32.mrb[6].mxu1 }
 0x107   : > { %v1786_v37 = vadd.f32 %v1785_v36, %v1784_v35  ;;  %v1152_v42 = vadd.f32 %v1783_v34, %v1613_v21  ;;  %v1825_v44 = vpop.f32.mrb[7].mxu1 }
 0x108   : > { %v1826_v49 = vadd.f32 %v1825_v44, %v1824_v47 }
 0x109   : > { %v1155_v48 = vadd.f32 %v1786_v37, %v1613_v21  ;;  %v1217_v8 = vadd.f32 %v1823_v46, %v1152_v42 }
 0x10b   : > { %v1787_v50 = vpop.f32.mrb[8].mxu0  ;;  %v1220_v51 = vadd.f32 %v1826_v49, %v1155_v48 }
 0x10c   : > { %v1788_v45 = vpop.f32.mrb[9].mxu0  ;;  %v1827_v13 = vpop.f32.mrb[8].mxu1 }
 0x10d   : > { %v1789_v52 = vadd.f32 %v1788_v45, %v1787_v50  ;;  %v1790_v53 = vpop.f32.mrb[10].mxu0  ;;  %v1828_v56 = vpop.f32.mrb[9].mxu1 }
 0x10e   : > { %v1791_v54 = vpop.f32.mrb[11].mxu0  ;;  %v1829_v9 = vadd.f32 %v1828_v56, %v1827_v13  ;;  %v1830_v31 = vpop.f32.mrb[10].mxu1 }
 0x10f   : > { %v1160_v55 = vadd.f32 %v1789_v52, %v1613_v21  ;;  %v1792_v33 = vadd.f32 %v1791_v54, %v1790_v53  ;;  %v1831_v59 = vpop.f32.mrb[11].mxu1 }
 0x110   : > { %v1832_v62 = vadd.f32 %v1831_v59, %v1830_v31 }
 0x111   : > { %v1163_v58 = vadd.f32 %v1792_v33, %v1613_v21  ;;  %v1225_v60 = vadd.f32 %v1829_v9, %v1160_v55 }
 0x113   : > { %v1228_v63 = vadd.f32 %v1832_v62, %v1163_v58  ;;  %v1793_v0 = vpop.f32.mrb[12].mxu0 }
 0x114   : > { %v1794_v2 = vpop.f32.mrb[13].mxu0 }
 0x115   : > { %v1795_v3 = vadd.f32 %v1794_v2, %v1793_v0  ;;  %v1796_v38 = vpop.f32.mrb[14].mxu0  ;;  %v1833_v5 = vpop.f32.mrb[12].mxu1 }
 0x116   : > { %v1797_v6 = vpop.f32.mrb[15].mxu0  ;;  %v1834_v61 = vpop.f32.mrb[13].mxu1 }
 0x117   : > { %v1168_v41 = vadd.f32 %v1795_v3, %v1613_v21  ;;  %v1798_v7 = vadd.f32 %v1797_v6, %v1796_v38  ;;  %v1835_v10 = vadd.f32 %v1834_v61, %v1833_v5  ;;  %v1836_v11 = vpop.f32.mrb[14].mxu1 }
 0x118   : > { %v1837_v15 = vpop.f32.mrb[15].mxu1 }
 0x119   : > { %v1171_v12 = vadd.f32 %v1798_v7, %v1613_v21  ;;  %v1233_v4 = vadd.f32 %v1835_v10, %v1168_v41  ;;  %v1838_v17 = vadd.f32 %v1837_v15, %v1836_v11  ;;  %v1718_v10 = vld [vmem:[%s245_s21] sm:$0xff]  }
 0x11b   : > { %v1236_v39 = vadd.f32 %v1838_v17, %v1171_v12  ;;  %v1855_v18 = vpop.f32.mrb[16].mxu0 }
 0x11c   : > { %v1856_v14 = vpop.f32.mrb[17].mxu0 }
 0x11d   : > { %v1857_v16 = vadd.f32 %v1856_v14, %v1855_v18  ;;  %v1858_v19 = vpop.f32.mrb[18].mxu0  ;;  %v1895_v24 = vpop.f32.mrb[16].mxu1 }
 0x11e   : > { %v1859_v20 = vpop.f32.mrb[19].mxu0  ;;  %v1896_v25 = vpop.f32.mrb[17].mxu1 }
 0x11f   : > { %v1274_v22 = vadd.f32 %v1857_v16, %v1209_v28  ;;  %v1860_v23 = vadd.f32 %v1859_v20, %v1858_v19  ;;  %v1897_v57 = vadd.f32 %v1896_v25, %v1895_v24  ;;  %v1898_v1 = vpop.f32.mrb[18].mxu1  ;;  %v1719_v19 = vunpack.c.l.bf16 %v1718_v10  ;;  %v1755_v24 = vld [vmem:[%s245_s21 + $0x18] sm:$0xff]  }
 0x120   : > { %v1899_v27 = vpop.f32.mrb[19].mxu1 }
 0x121   : > { %v1277_v26 = vadd.f32 %v1860_v23, %v1212_v32  ;;  %v1900_v30 = vadd.f32 %v1899_v27, %v1898_v1  ;;  %v1339_v34 = vadd.f32 %v1897_v57, %v1274_v22  ;;  %v1720_v27 = vunpack.c.h.bf16 %v1718_v10 }
 0x123   : > { %v1861_v29 = vpop.f32.mrb[20].mxu0  ;;  %v2505_v40 = vadd.f32 %v1900_v30, %v1277_v26 }
 0x124   : > { %v1862_v21 = vpop.f32.mrb[21].mxu0 }
 0x125   : > { %v1863_v35 = vadd.f32 %v1862_v21, %v1861_v29  ;;  %v1864_v36 = vpop.f32.mrb[22].mxu0  ;;  %v1901_v46 = vpop.f32.mrb[20].mxu1 }
 0x126   : > { %v1865_v37 = vpop.f32.mrb[23].mxu0  ;;  %v1902_v28 = vpop.f32.mrb[21].mxu1 }
 0x127   : > { %v1282_v42 = vadd.f32 %v1863_v35, %v1217_v8  ;;  %v1866_v43 = vadd.f32 %v1865_v37, %v1864_v36  ;;  %v1903_v48 = vadd.f32 %v1902_v28, %v1901_v46  ;;  %v1904_v32 = vpop.f32.mrb[22].mxu1  ;;  %v1731_v35 = vunpack.c.l.bf16 %v1755_v24 }
 0x128   : > { %v1905_v44 = vpop.f32.mrb[23].mxu1 }
 0x129   : > { %v1285_v47 = vadd.f32 %v1866_v43, %v1220_v51  ;;  %v1906_v50 = vadd.f32 %v1905_v44, %v1904_v32  ;;  %v1347_v52 = vadd.f32 %v1903_v48, %v1282_v42  ;;  %v1732_v48 = vunpack.c.h.bf16 %v1755_v24 }
 0x12b   : > { %v1867_v49 = vpop.f32.mrb[24].mxu0  ;;  %v1350_v55 = vadd.f32 %v1906_v50, %v1285_v47 }
 0x12c   : > { %v1868_v45 = vpop.f32.mrb[25].mxu0 }
 0x12d   : > { %v1869_v53 = vadd.f32 %v1868_v45, %v1867_v49  ;;  %v1870_v54 = vpop.f32.mrb[26].mxu0  ;;  %v1907_v8 = vpop.f32.mrb[24].mxu1 }
 0x12e   : > { %v1871_v13 = vpop.f32.mrb[27].mxu0  ;;  %v1908_v9 = vpop.f32.mrb[25].mxu1 }
 0x12f   : > { %v1290_v33 = vadd.f32 %v1869_v53, %v1225_v60  ;;  %v1872_v56 = vadd.f32 %v1871_v13, %v1870_v54  ;;  %v1909_v51 = vadd.f32 %v1908_v9, %v1907_v8  ;;  %v1910_v58 = vpop.f32.mrb[26].mxu1 }
 0x130   : > { %v1911_v59 = vpop.f32.mrb[27].mxu1 }
 0x131   : > { %v1293_v31 = vadd.f32 %v1872_v56, %v1228_v63  ;;  %v1912_v0 = vadd.f32 %v1911_v59, %v1910_v58  ;;  %v1355_v3 = vadd.f32 %v1909_v51, %v1290_v33  ;;  %v1753_v63 = vld [vmem:[%s245_s21 + $0x8] sm:$0xff]  }
 0x132   : > { %v1723_v18 = vunpack.c.l.bf16 %v1753_v63  ;;  %v1724_v26 = vunpack.c.h.bf16 %v1753_v63 }
 0x133   : > { %v1873_v62 = vpop.f32.mrb[28].mxu0  ;;  %v1358_v6 = vadd.f32 %v1912_v0, %v1293_v31 }
 0x134   : > { %v1874_v2 = vpop.f32.mrb[29].mxu0 }
 0x135   : > { %v1875_v38 = vadd.f32 %v1874_v2, %v1873_v62  ;;  %v1876_v5 = vpop.f32.mrb[30].mxu0  ;;  %v1913_v7 = vpop.f32.mrb[28].mxu1 }
 0x136   : > { %v1877_v60 = vpop.f32.mrb[31].mxu0  ;;  %v1914_v11 = vpop.f32.mrb[29].mxu1 }
 0x137   : > { %v1298_v41 = vadd.f32 %v1875_v38, %v1233_v4  ;;  %v1878_v61 = vadd.f32 %v1877_v60, %v1876_v5  ;;  %v1915_v15 = vadd.f32 %v1914_v11, %v1913_v7  ;;  %v1916_v17 = vpop.f32.mrb[30].mxu1  ;;  %v1754_v4 = vld [vmem:[%s245_s21 + $0x10] sm:$0xff]  }
 0x138   : > { %v1917_v14 = vpop.f32.mrb[31].mxu1  ;;  %v1727_v43 = vunpack.c.l.bf16 %v1754_v4  ;;  %v1728_v45 = vunpack.c.h.bf16 %v1754_v4 }
 0x139   : > { %v1301_v12 = vadd.f32 %v1878_v61, %v1236_v39  ;;  %v1918_v20 = vadd.f32 %v1917_v14, %v1916_v17  ;;  %v1363_v23 = vadd.f32 %v1915_v15, %v1298_v41 }
 0x13b   : > { %v1949_v16 = vpop.f32.mrb[32].mxu0  ;;  %v1366_v21 = vadd.f32 %v1918_v20, %v1301_v12 }
 0x13c   : > { %v1412_v22 = vadd.f32 %v1949_v16, %v1347_v52  ;;  %v1403_v25 = vpop.f32.mrb[33].mxu0 }
 0x13d   : > { %v1404_v57 = vadd.f32 %v1403_v25, %v1339_v34  ;;  %v1950_v1 = vpop.f32.mrb[34].mxu0  ;;  %v1953_v42 = vpop.f32.mrb[32].mxu1 }
 0x13e   : > { %v1452_v29 = vadd.f32 %v1723_v18, %v1412_v22  ;;  %v1415_v30 = vadd.f32 %v1950_v1, %v1350_v55  ;;  %v1406_v39 = vpop.f32.mrb[35].mxu0  ;;  %v1428_v28 = vadd.f32 %v1953_v42, %v1363_v23  ;;  %v1419_v47 = vpop.f32.mrb[33].mxu1 }
 0x13f   : > { %v1450_v36 = vadd.f32 %v1719_v19, %v1404_v57  ;;  %v1407_v37 = vadd.f32 %v1406_v39, %v2505_v40  ;;  %v1420_v44 = vadd.f32 %v1419_v47, %v1355_v3  ;;  %v1954_v50 = vpop.f32.mrb[34].mxu1 }
 0x140   : > { %v1453_v46 = vadd.f32 %v1724_v26, %v1415_v30  ;;  %v1460_v34 = vmax.f32 %v1452_v29, 0.0  ;;  %v1456_v52 = vadd.f32 %v1731_v35, %v1428_v28  ;;  %v1431_v40 = vadd.f32 %v1954_v50, %v1366_v21  ;;  %v1422_v13 = vpop.f32.mrb[35].mxu1 }
 0x141   : > { %v1451_v32 = vadd.f32 %v1720_v27, %v1407_v37  ;;  %v1458_v53 = vmax.f32 %v1450_v36, 0.0  ;;  %v1454_v55 = vadd.f32 %v1727_v43, %v1420_v44  ;;  %v1423_v56 = vadd.f32 %v1422_v13, %v1358_v6 }
 0x142   : > { %v1461_v49 = vmax.f32 %v1453_v46, 0.0  ;;  %v1457_v8 = vadd.f32 %v1732_v48, %v1431_v40  ;;  %v1464_v51 = vmax.f32 %v1456_v52, 0.0 }
 0x143   : > { %v1459_v54 = vmax.f32 %v1451_v32, 0.0  ;;  %v1455_v31 = vadd.f32 %v1728_v45, %v1423_v56  ;;  %v1462_v59 = vmax.f32 %v1454_v55, 0.0 }
 0x144   : > { %v1741_v33 = vpack.c.bf16 %v1461_v49, %v1460_v34  ;;  %v1465_v58 = vmax.f32 %v1457_v8, 0.0 }
 0x145   : > { %v1736_v9 = vpack.c.bf16 %v1459_v54, %v1458_v53  ;;  %v1463_v62 = vmax.f32 %v1455_v31, 0.0 }
 0x146   : > { %1756 = vst [vmem:[%s255_s24 + $0x8] sm:$0xff] %v1741_v33   ;;  %v1751_v0 = vpack.c.bf16 %v1465_v58, %v1464_v51 }
 0x147   : > { %1737 = vst [vmem:[%s255_s24] sm:$0xff] %v1736_v9   ;;  %v1746_v2 = vpack.c.bf16 %v1463_v62, %v1462_v59 }
 0x148   : > { %1758 = vst [vmem:[%s255_s24 + $0x18] sm:$0xff] %v1751_v0  }
 0x149   : > { %1757 = vst [vmem:[%s255_s24 + $0x10] sm:$0xff] %v1746_v2  }
 0x14a PF: > { %s14_s17 = sadd.s32 1, %s2119_s17   ;;  %s2533_s15 = smov %s2115_s16 }
 0x14b   : > { %p11_p5 = scmp.ge.s32.totalorder %s14_s17, 4   ;;  %s2534_s16 = smov %s2536_s18 }
 0x14d   :  { %13 = sbr.rel (!%p11_p5) target bundleno = 2 (0x2), region = 70 }

</bundles_post_ra>
